<compile_context>
chip_gen: v6e
topology: v6e:2x2x1
jax: 0.10.0
libtpu: 0.0.40
codegen_flags: <defaults>
</compile_context>

<pallas_src>
import math
from functools import partial

import jax
import jax.numpy as jnp
from jax.experimental import pallas as pl
from jax.experimental.pallas import tpu as pltpu


def _round_up(x, m):
    return (x + m - 1) // m * m


# ----------------------------------------------------------------------------
# Fused kernel: projections + multi-head attention + output projection
# ----------------------------------------------------------------------------

def _fused_cross_attention_kernel(q_ref, k_ref, v_ref,
                                  wq_ref, wk_ref, wv_ref, wp_ref, bp_ref,
                                  o_ref, *, num_heads):
    # Per grid step: one batch element, one query tile, the full KV length.
    q = q_ref[0].astype(jnp.bfloat16)          # (bq, Dq)
    k = k_ref[0].astype(jnp.bfloat16)          # (M , Dk)
    v = v_ref[0].astype(jnp.bfloat16)          # (M , Dv)

    # Input projections: bf16 MXU operands, f32 accumulation.
    # The softmax scale is pre-folded into wq (to_q has no bias).
    qp = jnp.dot(q, wq_ref[...], preferred_element_type=jnp.float32)   # (bq, dim)
    kp = jnp.dot(k, wk_ref[...], preferred_element_type=jnp.float32)   # (M , dim)
    vp = jnp.dot(v, wv_ref[...], preferred_element_type=jnp.float32)   # (M , dim)

    dim = qp.shape[-1]
    hd = dim // num_heads

    # Per-head attention with the output projection accumulated head-by-head:
    # no concat/reshape/transpose relayouts, intermediates never leave VMEM.
    acc = jnp.zeros(o_ref.shape[1:], jnp.float32)                      # (bq, dim)
    for h in range(num_heads):
        lo, hi = h * hd, (h + 1) * hd
        qh = qp[:, lo:hi]                                              # (bq, hd)
        kh = kp[:, lo:hi]                                              # (M , hd)
        vh = vp[:, lo:hi]                                              # (M , hd)

        # Scores (f32): (bq, hd) x (M, hd)^T -> (bq, M)
        s = jnp.einsum('nd,md->nm', qh, kh,
                       preferred_element_type=jnp.float32)
        s = s - jnp.max(s, axis=-1, keepdims=True)
        p = jnp.exp(s)
        p = p * pl.reciprocal(jnp.sum(p, axis=-1, keepdims=True), approx=True)

        oh = jnp.dot(p, vh, preferred_element_type=jnp.float32)        # (bq, hd)
        # Fused output projection contribution of this head's columns of W_p.
        acc = acc + jnp.dot(oh.astype(jnp.bfloat16), wp_ref[lo:hi, :],
                            preferred_element_type=jnp.float32)        # (bq, dim)

    # Lane-dense store: last dim == dim (multiple of hd*H), never hd-wide.
    o_ref[0] = (acc + bp_ref[...]).astype(o_ref.dtype)


# ----------------------------------------------------------------------------
# One-time parameter prep (OUTSIDE the jitted forward): transpose to (in, out),
# fold the softmax scale into wq, cast to bf16.
# ----------------------------------------------------------------------------

def prepare_params(raw, *, num_heads):
    dim = raw['wq'].shape[0]
    hd = dim // num_heads
    scale = hd ** (-0.5)
    return {
        'wq_t': (raw['wq'].T * scale).astype(jnp.bfloat16),     # (Dq, dim)
        'wk_t': raw['wk'].T.astype(jnp.bfloat16),                # (Dk, dim)
        'wv_t': raw['wv'].T.astype(jnp.bfloat16),                # (Dv, dim)
        'wp_t': raw['wp'].T.astype(jnp.bfloat16),                # (dim, dim)
        'bp':   raw['bp'].astype(jnp.float32).reshape(1, dim),   # (1, dim)
    }


# ----------------------------------------------------------------------------
# Forward (mirrors the PyTorch module)
# ----------------------------------------------------------------------------

def cross_attention_forward(params, q, k, v, *, num_heads):
    B, N, Dq = q.shape
    M, Dk = k.shape[1], k.shape[2]
    Dv = v.shape[2]
    dim = params['wp_t'].shape[0]

    # Query tiling: one block covers all of N at small N; tiles (with padding)
    # for long query sequences, keeping VMEM bounded and adding parallel work.
    block_q = min(128, _round_up(N, 8))
    Np = _round_up(N, block_q)
    q_in = q if Np == N else jnp.pad(q, ((0, 0), (0, Np - N), (0, 0)))
    n_q = Np // block_q

    out = pl.pallas_call(
        partial(_fused_cross_attention_kernel, num_heads=num_heads),
        grid_spec=pltpu.PrefetchScalarGridSpec(
            num_scalar_prefetch=0,
            grid=(B, n_q),
            in_specs=[
                pl.BlockSpec((1, block_q, Dq), lambda b, i: (b, i, 0)),  # q
                pl.BlockSpec((1, M, Dk),       lambda b, i: (b, 0, 0)),  # k
                pl.BlockSpec((1, M, Dv),       lambda b, i: (b, 0, 0)),  # v
                pl.BlockSpec((Dq, dim),        lambda b, i: (0, 0)),     # wq_t
                pl.BlockSpec((Dk, dim),        lambda b, i: (0, 0)),     # wk_t
                pl.BlockSpec((Dv, dim),        lambda b, i: (0, 0)),     # wv_t
                pl.BlockSpec((dim, dim),       lambda b, i: (0, 0)),     # wp_t
                pl.BlockSpec((1, dim),         lambda b, i: (0, 0)),     # bias
            ],
            out_specs=pl.BlockSpec((1, block_q, dim), lambda b, i: (b, i, 0)),
        ),
        out_shape=jax.ShapeDtypeStruct((B, Np, dim), jnp.float32),
        compiler_params=pltpu.CompilerParams(
            dimension_semantics=("parallel", "parallel")),
    )(q_in, k, v, params['wq_t'], params['wk_t'], params['wv_t'],
      params['wp_t'], params['bp'])

    return out if Np == N else out[:, :N, :]


# ----------------------------------------------------------------------------
# Pure-JAX f32 reference (PyTorch semantics) for a sanity check
# ----------------------------------------------------------------------------

def reference(raw, q, k, v, *, num_heads):
    dim = raw['wq'].shape[0]
    hd = dim // num_heads
    scale = hd ** (-0.5)
    B, N, _ = q.shape
    M = k.shape[1]
    qp = scale * (q @ raw['wq'].T)
    kp = k @ raw['wk'].T
    vp = v @ raw['wv'].T
    qh = qp.reshape(B, N, num_heads, hd).transpose(0, 2, 1, 3)
    kh = kp.reshape(B, M, num_heads, hd).transpose(0, 2, 1, 3)
    vh = vp.reshape(B, M, num_heads, hd).transpose(0, 2, 1, 3)
    attn = jax.nn.softmax(jnp.einsum('bhnd,bhmd->bhnm', qh, kh), axis=-1)
    x = jnp.einsum('bhnm,bhmd->bhnd', attn, vh)
    x = x.transpose(0, 2, 1, 3).reshape(B, N, dim)
    return x @ raw['wp'].T + raw['bp']


# ----------------------------------------------------------------------------
# Main
# ----------------------------------------------------------------------------

if __name__ == "__main__":
    B, N, M = 2, 16, 32                   # batch, query len, key/value len
    dim, num_heads = 64, 8                # head_dim = 8 (NOT padded to 128)
    dim_q, dim_k, dim_v = 48, 40, 40

    key = jax.random.PRNGKey(0)
    ks = jax.random.split(key, 8)
    raw = {
        'wq': jax.random.normal(ks[0], (dim, dim_q), jnp.float32) / math.sqrt(dim_q),
        'wk': jax.random.normal(ks[1], (dim, dim_k), jnp.float32) / math.sqrt(dim_k),
        'wv': jax.random.normal(ks[2], (dim, dim_v), jnp.float32) / math.sqrt(dim_v),
        'wp': jax.random.normal(ks[3], (dim, dim), jnp.float32) / math.sqrt(dim),
        'bp': 0.01 * jax.random.normal(ks[4], (dim,), jnp.float32),
    }
    q = jax.random.normal(ks[5], (B, N, dim_q), jnp.float32)
    k = jax.random.normal(ks[6], (B, M, dim_k), jnp.float32)
    v = jax.random.normal(ks[7], (B, M, dim_v), jnp.float32)

    # Weight prep happens ONCE, outside the jitted forward (no per-call glue).
    params = prepare_params(raw, num_heads=num_heads)

    fwd = jax.jit(partial(cross_attention_forward, num_heads=num_heads))
    out = jax.block_until_ready(fwd(params, q, k, v))

    assert out.shape == (B, N, dim), out.shape
    assert bool(jnp.all(jnp.isfinite(out)))

    ref = reference(raw, q, k, v, num_heads=num_heads)
    abs_err = float(jnp.max(jnp.abs(out - ref)))
    rel_err = abs_err / (float(jnp.max(jnp.abs(ref))) + 1e-6)
    assert rel_err < 0.08, f"error vs f32 reference too large: abs={abs_err}, rel={rel_err}"

    print("KERNEL_OK")
</pallas_src>

<mosaic_0001>
module attributes {stable_mosaic.version = 11 : i64} {
  func.func @_fused_cross_attention_kernel(%arg0: i32, %arg1: i32, %arg2: memref<1x16x48xf32, #tpu.memory_space<vmem>>, %arg3: memref<1x32x40xf32, #tpu.memory_space<vmem>>, %arg4: memref<1x32x40xf32, #tpu.memory_space<vmem>>, %arg5: memref<48x64xbf16, #tpu.memory_space<vmem>>, %arg6: memref<40x64xbf16, #tpu.memory_space<vmem>>, %arg7: memref<40x64xbf16, #tpu.memory_space<vmem>>, %arg8: memref<64x64xbf16, #tpu.memory_space<vmem>>, %arg9: memref<1x64xf32, #tpu.memory_space<vmem>>, %arg10: memref<1x16x64xf32, #tpu.memory_space<vmem>>) attributes {dimension_semantics = [#tpu.dimension_semantics<parallel>, #tpu.dimension_semantics<parallel>], iteration_bounds = array<i64: 2, 1>, scalar_prefetch = 0 : i64, scratch_operands = 0 : i64, tpu.core_type = #tpu.core_type<tc>, window_params = [{transform_indices = @transform_0, window_bounds = array<i64: 1, 16, 48>}, {transform_indices = @transform_1, window_bounds = array<i64: 1, 32, 40>}, {transform_indices = @transform_2, window_bounds = array<i64: 1, 32, 40>}, {pipeline_mode = #tpu.pipeline_mode<synchronous>, transform_indices = @transform_3, window_bounds = array<i64: 48, 64>}, {pipeline_mode = #tpu.pipeline_mode<synchronous>, transform_indices = @transform_4, window_bounds = array<i64: 40, 64>}, {pipeline_mode = #tpu.pipeline_mode<synchronous>, transform_indices = @transform_5, window_bounds = array<i64: 40, 64>}, {pipeline_mode = #tpu.pipeline_mode<synchronous>, transform_indices = @transform_6, window_bounds = array<i64: 64, 64>}, {pipeline_mode = #tpu.pipeline_mode<synchronous>, transform_indices = @transform_7, window_bounds = array<i64: 1, 64>}, {transform_indices = @transform_8, window_bounds = array<i64: 1, 16, 64>}]} {
    %c0 = arith.constant 0 : index
    %c0_0 = arith.constant 0 : index
    %c0_1 = arith.constant 0 : index
    %0 = vector.load %arg2[%c0, %c0_0, %c0_1] : memref<1x16x48xf32, #tpu.memory_space<vmem>>, vector<1x16x48xf32>
    %1 = vector.shape_cast %0 : vector<1x16x48xf32> to vector<16x48xf32>
    %2 = arith.truncf %1 : vector<16x48xf32> to vector<16x48xbf16>
    %c0_2 = arith.constant 0 : index
    %c0_3 = arith.constant 0 : index
    %c0_4 = arith.constant 0 : index
    %3 = vector.load %arg3[%c0_2, %c0_3, %c0_4] : memref<1x32x40xf32, #tpu.memory_space<vmem>>, vector<1x32x40xf32>
    %4 = vector.shape_cast %3 : vector<1x32x40xf32> to vector<32x40xf32>
    %5 = arith.truncf %4 : vector<32x40xf32> to vector<32x40xbf16>
    %c0_5 = arith.constant 0 : index
    %c0_6 = arith.constant 0 : index
    %c0_7 = arith.constant 0 : index
    %6 = vector.load %arg4[%c0_5, %c0_6, %c0_7] : memref<1x32x40xf32, #tpu.memory_space<vmem>>, vector<1x32x40xf32>
    %7 = vector.shape_cast %6 : vector<1x32x40xf32> to vector<32x40xf32>
    %8 = arith.truncf %7 : vector<32x40xf32> to vector<32x40xbf16>
    %c0_8 = arith.constant 0 : index
    %c0_9 = arith.constant 0 : index
    %9 = vector.load %arg5[%c0_8, %c0_9] : memref<48x64xbf16, #tpu.memory_space<vmem>>, vector<48x64xbf16>
    %cst = arith.constant dense<0.000000e+00> : vector<16x64xf32>
    %10 = tpu.matmul %2, %9, %cst {dimension_numbers = #tpu.dot_dimension_numbers<[1], [0], [0], [1], [0, 0, 1, 1], [], []>} : vector<16x48xbf16>, vector<48x64xbf16>, vector<16x64xf32> -> vector<16x64xf32>
    %c0_10 = arith.constant 0 : index
    %c0_11 = arith.constant 0 : index
    %11 = vector.load %arg6[%c0_10, %c0_11] : memref<40x64xbf16, #tpu.memory_space<vmem>>, vector<40x64xbf16>
    %cst_12 = arith.constant dense<0.000000e+00> : vector<32x64xf32>
    %12 = tpu.matmul %5, %11, %cst_12 {dimension_numbers = #tpu.dot_dimension_numbers<[1], [0], [0], [1], [0, 0, 1, 1], [], []>} : vector<32x40xbf16>, vector<40x64xbf16>, vector<32x64xf32> -> vector<32x64xf32>
    %c0_13 = arith.constant 0 : index
    %c0_14 = arith.constant 0 : index
    %13 = vector.load %arg7[%c0_13, %c0_14] : memref<40x64xbf16, #tpu.memory_space<vmem>>, vector<40x64xbf16>
    %cst_15 = arith.constant dense<0.000000e+00> : vector<32x64xf32>
    %14 = tpu.matmul %8, %13, %cst_15 {dimension_numbers = #tpu.dot_dimension_numbers<[1], [0], [0], [1], [0, 0, 1, 1], [], []>} : vector<32x40xbf16>, vector<40x64xbf16>, vector<32x64xf32> -> vector<32x64xf32>
    %cst_16 = arith.constant 0.000000e+00 : f32
    %15 = vector.broadcast %cst_16 : f32 to vector<16x64xf32>
    %16 = vector.extract_strided_slice %10 {offsets = [0, 0], sizes = [16, 8], strides = [1, 1]} : vector<16x64xf32> to vector<16x8xf32>
    %17 = vector.extract_strided_slice %12 {offsets = [0, 0], sizes = [32, 8], strides = [1, 1]} : vector<32x64xf32> to vector<32x8xf32>
    %18 = vector.extract_strided_slice %14 {offsets = [0, 0], sizes = [32, 8], strides = [1, 1]} : vector<32x64xf32> to vector<32x8xf32>
    "tpu.trace_start"() <{level = 10 : i32, message = "nd,md->nm"}> : () -> ()
    %cst_17 = arith.constant dense<0.000000e+00> : vector<16x32xf32>
    %19 = tpu.matmul %16, %17, %cst_17 {dimension_numbers = #tpu.dot_dimension_numbers<[1], [1], [0], [0], [0, 0, 1, 0], [], []>} : vector<16x8xf32>, vector<32x8xf32>, vector<16x32xf32> -> vector<16x32xf32>
    "tpu.trace_stop"() : () -> ()
    %cst_18 = arith.constant dense<0xFF800000> : vector<16xf32>
    %20 = vector.multi_reduction <maximumf>, %19, %cst_18 [1] : vector<16x32xf32> to vector<16xf32>
    %21 = vector.shape_cast %20 : vector<16xf32> to vector<16x1xf32>
    %22 = vector.broadcast %21 : vector<16x1xf32> to vector<16x32xf32>
    %23 = arith.subf %19, %22 : vector<16x32xf32>
    %24 = math.exp %23 : vector<16x32xf32>
    %cst_19 = arith.constant dense<0.000000e+00> : vector<16xf32>
    %25 = vector.multi_reduction <add>, %24, %cst_19 [1] : vector<16x32xf32> to vector<16xf32>
    %26 = vector.shape_cast %25 : vector<16xf32> to vector<16x1xf32>
    %27 = tpu.reciprocal %26 {approx = true} : vector<16x1xf32> -> vector<16x1xf32>
    %28 = vector.broadcast %27 : vector<16x1xf32> to vector<16x32xf32>
    %29 = arith.mulf %24, %28 : vector<16x32xf32>
    %cst_20 = arith.constant dense<0.000000e+00> : vector<16x8xf32>
    %30 = tpu.matmul %29, %18, %cst_20 {dimension_numbers = #tpu.dot_dimension_numbers<[1], [0], [0], [1], [0, 0, 1, 1], [], []>} : vector<16x32xf32>, vector<32x8xf32>, vector<16x8xf32> -> vector<16x8xf32>
    %31 = arith.truncf %30 : vector<16x8xf32> to vector<16x8xbf16>
    %c0_21 = arith.constant 0 : index
    %c0_22 = arith.constant 0 : index
    %32 = vector.load %arg8[%c0_21, %c0_22] : memref<64x64xbf16, #tpu.memory_space<vmem>>, vector<8x64xbf16>
    %cst_23 = arith.constant dense<0.000000e+00> : vector<16x64xf32>
    %33 = tpu.matmul %31, %32, %cst_23 {dimension_numbers = #tpu.dot_dimension_numbers<[1], [0], [0], [1], [0, 0, 1, 1], [], []>} : vector<16x8xbf16>, vector<8x64xbf16>, vector<16x64xf32> -> vector<16x64xf32>
    %34 = arith.addf %15, %33 : vector<16x64xf32>
    %35 = vector.extract_strided_slice %10 {offsets = [0, 8], sizes = [16, 8], strides = [1, 1]} : vector<16x64xf32> to vector<16x8xf32>
    %36 = vector.extract_strided_slice %12 {offsets = [0, 8], sizes = [32, 8], strides = [1, 1]} : vector<32x64xf32> to vector<32x8xf32>
    %37 = vector.extract_strided_slice %14 {offsets = [0, 8], sizes = [32, 8], strides = [1, 1]} : vector<32x64xf32> to vector<32x8xf32>
    "tpu.trace_start"() <{level = 10 : i32, message = "nd,md->nm"}> : () -> ()
    %cst_24 = arith.constant dense<0.000000e+00> : vector<16x32xf32>
    %38 = tpu.matmul %35, %36, %cst_24 {dimension_numbers = #tpu.dot_dimension_numbers<[1], [1], [0], [0], [0, 0, 1, 0], [], []>} : vector<16x8xf32>, vector<32x8xf32>, vector<16x32xf32> -> vector<16x32xf32>
    "tpu.trace_stop"() : () -> ()
    %cst_25 = arith.constant dense<0xFF800000> : vector<16xf32>
    %39 = vector.multi_reduction <maximumf>, %38, %cst_25 [1] : vector<16x32xf32> to vector<16xf32>
    %40 = vector.shape_cast %39 : vector<16xf32> to vector<16x1xf32>
    %41 = vector.broadcast %40 : vector<16x1xf32> to vector<16x32xf32>
    %42 = arith.subf %38, %41 : vector<16x32xf32>
    %43 = math.exp %42 : vector<16x32xf32>
    %cst_26 = arith.constant dense<0.000000e+00> : vector<16xf32>
    %44 = vector.multi_reduction <add>, %43, %cst_26 [1] : vector<16x32xf32> to vector<16xf32>
    %45 = vector.shape_cast %44 : vector<16xf32> to vector<16x1xf32>
    %46 = tpu.reciprocal %45 {approx = true} : vector<16x1xf32> -> vector<16x1xf32>
    %47 = vector.broadcast %46 : vector<16x1xf32> to vector<16x32xf32>
    %48 = arith.mulf %43, %47 : vector<16x32xf32>
    %cst_27 = arith.constant dense<0.000000e+00> : vector<16x8xf32>
    %49 = tpu.matmul %48, %37, %cst_27 {dimension_numbers = #tpu.dot_dimension_numbers<[1], [0], [0], [1], [0, 0, 1, 1], [], []>} : vector<16x32xf32>, vector<32x8xf32>, vector<16x8xf32> -> vector<16x8xf32>
    %50 = arith.truncf %49 : vector<16x8xf32> to vector<16x8xbf16>
    %c8 = arith.constant 8 : index
    %c0_28 = arith.constant 0 : index
    %51 = vector.load %arg8[%c8, %c0_28] : memref<64x64xbf16, #tpu.memory_space<vmem>>, vector<8x64xbf16>
    %cst_29 = arith.constant dense<0.000000e+00> : vector<16x64xf32>
    %52 = tpu.matmul %50, %51, %cst_29 {dimension_numbers = #tpu.dot_dimension_numbers<[1], [0], [0], [1], [0, 0, 1, 1], [], []>} : vector<16x8xbf16>, vector<8x64xbf16>, vector<16x64xf32> -> vector<16x64xf32>
    %53 = arith.addf %34, %52 : vector<16x64xf32>
    %54 = vector.extract_strided_slice %10 {offsets = [0, 16], sizes = [16, 8], strides = [1, 1]} : vector<16x64xf32> to vector<16x8xf32>
    %55 = vector.extract_strided_slice %12 {offsets = [0, 16], sizes = [32, 8], strides = [1, 1]} : vector<32x64xf32> to vector<32x8xf32>
    %56 = vector.extract_strided_slice %14 {offsets = [0, 16], sizes = [32, 8], strides = [1, 1]} : vector<32x64xf32> to vector<32x8xf32>
    "tpu.trace_start"() <{level = 10 : i32, message = "nd,md->nm"}> : () -> ()
    %cst_30 = arith.constant dense<0.000000e+00> : vector<16x32xf32>
    %57 = tpu.matmul %54, %55, %cst_30 {dimension_numbers = #tpu.dot_dimension_numbers<[1], [1], [0], [0], [0, 0, 1, 0], [], []>} : vector<16x8xf32>, vector<32x8xf32>, vector<16x32xf32> -> vector<16x32xf32>
    "tpu.trace_stop"() : () -> ()
    %cst_31 = arith.constant dense<0xFF800000> : vector<16xf32>
    %58 = vector.multi_reduction <maximumf>, %57, %cst_31 [1] : vector<16x32xf32> to vector<16xf32>
    %59 = vector.shape_cast %58 : vector<16xf32> to vector<16x1xf32>
    %60 = vector.broadcast %59 : vector<16x1xf32> to vector<16x32xf32>
    %61 = arith.subf %57, %60 : vector<16x32xf32>
    %62 = math.exp %61 : vector<16x32xf32>
    %cst_32 = arith.constant dense<0.000000e+00> : vector<16xf32>
    %63 = vector.multi_reduction <add>, %62, %cst_32 [1] : vector<16x32xf32> to vector<16xf32>
    %64 = vector.shape_cast %63 : vector<16xf32> to vector<16x1xf32>
    %65 = tpu.reciprocal %64 {approx = true} : vector<16x1xf32> -> vector<16x1xf32>
    %66 = vector.broadcast %65 : vector<16x1xf32> to vector<16x32xf32>
    %67 = arith.mulf %62, %66 : vector<16x32xf32>
    %cst_33 = arith.constant dense<0.000000e+00> : vector<16x8xf32>
    %68 = tpu.matmul %67, %56, %cst_33 {dimension_numbers = #tpu.dot_dimension_numbers<[1], [0], [0], [1], [0, 0, 1, 1], [], []>} : vector<16x32xf32>, vector<32x8xf32>, vector<16x8xf32> -> vector<16x8xf32>
    %69 = arith.truncf %68 : vector<16x8xf32> to vector<16x8xbf16>
    %c16 = arith.constant 16 : index
    %c0_34 = arith.constant 0 : index
    %70 = vector.load %arg8[%c16, %c0_34] : memref<64x64xbf16, #tpu.memory_space<vmem>>, vector<8x64xbf16>
    %cst_35 = arith.constant dense<0.000000e+00> : vector<16x64xf32>
    %71 = tpu.matmul %69, %70, %cst_35 {dimension_numbers = #tpu.dot_dimension_numbers<[1], [0], [0], [1], [0, 0, 1, 1], [], []>} : vector<16x8xbf16>, vector<8x64xbf16>, vector<16x64xf32> -> vector<16x64xf32>
    %72 = arith.addf %53, %71 : vector<16x64xf32>
    %73 = vector.extract_strided_slice %10 {offsets = [0, 24], sizes = [16, 8], strides = [1, 1]} : vector<16x64xf32> to vector<16x8xf32>
    %74 = vector.extract_strided_slice %12 {offsets = [0, 24], sizes = [32, 8], strides = [1, 1]} : vector<32x64xf32> to vector<32x8xf32>
    %75 = vector.extract_strided_slice %14 {offsets = [0, 24], sizes = [32, 8], strides = [1, 1]} : vector<32x64xf32> to vector<32x8xf32>
    "tpu.trace_start"() <{level = 10 : i32, message = "nd,md->nm"}> : () -> ()
    %cst_36 = arith.constant dense<0.000000e+00> : vector<16x32xf32>
    %76 = tpu.matmul %73, %74, %cst_36 {dimension_numbers = #tpu.dot_dimension_numbers<[1], [1], [0], [0], [0, 0, 1, 0], [], []>} : vector<16x8xf32>, vector<32x8xf32>, vector<16x32xf32> -> vector<16x32xf32>
    "tpu.trace_stop"() : () -> ()
    %cst_37 = arith.constant dense<0xFF800000> : vector<16xf32>
    %77 = vector.multi_reduction <maximumf>, %76, %cst_37 [1] : vector<16x32xf32> to vector<16xf32>
    %78 = vector.shape_cast %77 : vector<16xf32> to vector<16x1xf32>
    %79 = vector.broadcast %78 : vector<16x1xf32> to vector<16x32xf32>
    %80 = arith.subf %76, %79 : vector<16x32xf32>
    %81 = math.exp %80 : vector<16x32xf32>
    %cst_38 = arith.constant dense<0.000000e+00> : vector<16xf32>
    %82 = vector.multi_reduction <add>, %81, %cst_38 [1] : vector<16x32xf32> to vector<16xf32>
    %83 = vector.shape_cast %82 : vector<16xf32> to vector<16x1xf32>
    %84 = tpu.reciprocal %83 {approx = true} : vector<16x1xf32> -> vector<16x1xf32>
    %85 = vector.broadcast %84 : vector<16x1xf32> to vector<16x32xf32>
    %86 = arith.mulf %81, %85 : vector<16x32xf32>
    %cst_39 = arith.constant dense<0.000000e+00> : vector<16x8xf32>
    %87 = tpu.matmul %86, %75, %cst_39 {dimension_numbers = #tpu.dot_dimension_numbers<[1], [0], [0], [1], [0, 0, 1, 1], [], []>} : vector<16x32xf32>, vector<32x8xf32>, vector<16x8xf32> -> vector<16x8xf32>
    %88 = arith.truncf %87 : vector<16x8xf32> to vector<16x8xbf16>
    %c24 = arith.constant 24 : index
    %c0_40 = arith.constant 0 : index
    %89 = vector.load %arg8[%c24, %c0_40] : memref<64x64xbf16, #tpu.memory_space<vmem>>, vector<8x64xbf16>
    %cst_41 = arith.constant dense<0.000000e+00> : vector<16x64xf32>
    %90 = tpu.matmul %88, %89, %cst_41 {dimension_numbers = #tpu.dot_dimension_numbers<[1], [0], [0], [1], [0, 0, 1, 1], [], []>} : vector<16x8xbf16>, vector<8x64xbf16>, vector<16x64xf32> -> vector<16x64xf32>
    %91 = arith.addf %72, %90 : vector<16x64xf32>
    %92 = vector.extract_strided_slice %10 {offsets = [0, 32], sizes = [16, 8], strides = [1, 1]} : vector<16x64xf32> to vector<16x8xf32>
    %93 = vector.extract_strided_slice %12 {offsets = [0, 32], sizes = [32, 8], strides = [1, 1]} : vector<32x64xf32> to vector<32x8xf32>
    %94 = vector.extract_strided_slice %14 {offsets = [0, 32], sizes = [32, 8], strides = [1, 1]} : vector<32x64xf32> to vector<32x8xf32>
    "tpu.trace_start"() <{level = 10 : i32, message = "nd,md->nm"}> : () -> ()
    %cst_42 = arith.constant dense<0.000000e+00> : vector<16x32xf32>
    %95 = tpu.matmul %92, %93, %cst_42 {dimension_numbers = #tpu.dot_dimension_numbers<[1], [1], [0], [0], [0, 0, 1, 0], [], []>} : vector<16x8xf32>, vector<32x8xf32>, vector<16x32xf32> -> vector<16x32xf32>
    "tpu.trace_stop"() : () -> ()
    %cst_43 = arith.constant dense<0xFF800000> : vector<16xf32>
    %96 = vector.multi_reduction <maximumf>, %95, %cst_43 [1] : vector<16x32xf32> to vector<16xf32>
    %97 = vector.shape_cast %96 : vector<16xf32> to vector<16x1xf32>
    %98 = vector.broadcast %97 : vector<16x1xf32> to vector<16x32xf32>
    %99 = arith.subf %95, %98 : vector<16x32xf32>
    %100 = math.exp %99 : vector<16x32xf32>
    %cst_44 = arith.constant dense<0.000000e+00> : vector<16xf32>
    %101 = vector.multi_reduction <add>, %100, %cst_44 [1] : vector<16x32xf32> to vector<16xf32>
    %102 = vector.shape_cast %101 : vector<16xf32> to vector<16x1xf32>
    %103 = tpu.reciprocal %102 {approx = true} : vector<16x1xf32> -> vector<16x1xf32>
    %104 = vector.broadcast %103 : vector<16x1xf32> to vector<16x32xf32>
    %105 = arith.mulf %100, %104 : vector<16x32xf32>
    %cst_45 = arith.constant dense<0.000000e+00> : vector<16x8xf32>
    %106 = tpu.matmul %105, %94, %cst_45 {dimension_numbers = #tpu.dot_dimension_numbers<[1], [0], [0], [1], [0, 0, 1, 1], [], []>} : vector<16x32xf32>, vector<32x8xf32>, vector<16x8xf32> -> vector<16x8xf32>
    %107 = arith.truncf %106 : vector<16x8xf32> to vector<16x8xbf16>
    %c32 = arith.constant 32 : index
    %c0_46 = arith.constant 0 : index
    %108 = vector.load %arg8[%c32, %c0_46] : memref<64x64xbf16, #tpu.memory_space<vmem>>, vector<8x64xbf16>
    %cst_47 = arith.constant dense<0.000000e+00> : vector<16x64xf32>
    %109 = tpu.matmul %107, %108, %cst_47 {dimension_numbers = #tpu.dot_dimension_numbers<[1], [0], [0], [1], [0, 0, 1, 1], [], []>} : vector<16x8xbf16>, vector<8x64xbf16>, vector<16x64xf32> -> vector<16x64xf32>
    %110 = arith.addf %91, %109 : vector<16x64xf32>
    %111 = vector.extract_strided_slice %10 {offsets = [0, 40], sizes = [16, 8], strides = [1, 1]} : vector<16x64xf32> to vector<16x8xf32>
    %112 = vector.extract_strided_slice %12 {offsets = [0, 40], sizes = [32, 8], strides = [1, 1]} : vector<32x64xf32> to vector<32x8xf32>
    %113 = vector.extract_strided_slice %14 {offsets = [0, 40], sizes = [32, 8], strides = [1, 1]} : vector<32x64xf32> to vector<32x8xf32>
    "tpu.trace_start"() <{level = 10 : i32, message = "nd,md->nm"}> : () -> ()
    %cst_48 = arith.constant dense<0.000000e+00> : vector<16x32xf32>
    %114 = tpu.matmul %111, %112, %cst_48 {dimension_numbers = #tpu.dot_dimension_numbers<[1], [1], [0], [0], [0, 0, 1, 0], [], []>} : vector<16x8xf32>, vector<32x8xf32>, vector<16x32xf32> -> vector<16x32xf32>
    "tpu.trace_stop"() : () -> ()
    %cst_49 = arith.constant dense<0xFF800000> : vector<16xf32>
    %115 = vector.multi_reduction <maximumf>, %114, %cst_49 [1] : vector<16x32xf32> to vector<16xf32>
    %116 = vector.shape_cast %115 : vector<16xf32> to vector<16x1xf32>
    %117 = vector.broadcast %116 : vector<16x1xf32> to vector<16x32xf32>
    %118 = arith.subf %114, %117 : vector<16x32xf32>
    %119 = math.exp %118 : vector<16x32xf32>
    %cst_50 = arith.constant dense<0.000000e+00> : vector<16xf32>
    %120 = vector.multi_reduction <add>, %119, %cst_50 [1] : vector<16x32xf32> to vector<16xf32>
    %121 = vector.shape_cast %120 : vector<16xf32> to vector<16x1xf32>
    %122 = tpu.reciprocal %121 {approx = true} : vector<16x1xf32> -> vector<16x1xf32>
    %123 = vector.broadcast %122 : vector<16x1xf32> to vector<16x32xf32>
    %124 = arith.mulf %119, %123 : vector<16x32xf32>
    %cst_51 = arith.constant dense<0.000000e+00> : vector<16x8xf32>
    %125 = tpu.matmul %124, %113, %cst_51 {dimension_numbers = #tpu.dot_dimension_numbers<[1], [0], [0], [1], [0, 0, 1, 1], [], []>} : vector<16x32xf32>, vector<32x8xf32>, vector<16x8xf32> -> vector<16x8xf32>
    %126 = arith.truncf %125 : vector<16x8xf32> to vector<16x8xbf16>
    %c40 = arith.constant 40 : index
    %c0_52 = arith.constant 0 : index
    %127 = vector.load %arg8[%c40, %c0_52] : memref<64x64xbf16, #tpu.memory_space<vmem>>, vector<8x64xbf16>
    %cst_53 = arith.constant dense<0.000000e+00> : vector<16x64xf32>
    %128 = tpu.matmul %126, %127, %cst_53 {dimension_numbers = #tpu.dot_dimension_numbers<[1], [0], [0], [1], [0, 0, 1, 1], [], []>} : vector<16x8xbf16>, vector<8x64xbf16>, vector<16x64xf32> -> vector<16x64xf32>
    %129 = arith.addf %110, %128 : vector<16x64xf32>
    %130 = vector.extract_strided_slice %10 {offsets = [0, 48], sizes = [16, 8], strides = [1, 1]} : vector<16x64xf32> to vector<16x8xf32>
    %131 = vector.extract_strided_slice %12 {offsets = [0, 48], sizes = [32, 8], strides = [1, 1]} : vector<32x64xf32> to vector<32x8xf32>
    %132 = vector.extract_strided_slice %14 {offsets = [0, 48], sizes = [32, 8], strides = [1, 1]} : vector<32x64xf32> to vector<32x8xf32>
    "tpu.trace_start"() <{level = 10 : i32, message = "nd,md->nm"}> : () -> ()
    %cst_54 = arith.constant dense<0.000000e+00> : vector<16x32xf32>
    %133 = tpu.matmul %130, %131, %cst_54 {dimension_numbers = #tpu.dot_dimension_numbers<[1], [1], [0], [0], [0, 0, 1, 0], [], []>} : vector<16x8xf32>, vector<32x8xf32>, vector<16x32xf32> -> vector<16x32xf32>
    "tpu.trace_stop"() : () -> ()
    %cst_55 = arith.constant dense<0xFF800000> : vector<16xf32>
    %134 = vector.multi_reduction <maximumf>, %133, %cst_55 [1] : vector<16x32xf32> to vector<16xf32>
    %135 = vector.shape_cast %134 : vector<16xf32> to vector<16x1xf32>
    %136 = vector.broadcast %135 : vector<16x1xf32> to vector<16x32xf32>
    %137 = arith.subf %133, %136 : vector<16x32xf32>
    %138 = math.exp %137 : vector<16x32xf32>
    %cst_56 = arith.constant dense<0.000000e+00> : vector<16xf32>
    %139 = vector.multi_reduction <add>, %138, %cst_56 [1] : vector<16x32xf32> to vector<16xf32>
    %140 = vector.shape_cast %139 : vector<16xf32> to vector<16x1xf32>
    %141 = tpu.reciprocal %140 {approx = true} : vector<16x1xf32> -> vector<16x1xf32>
    %142 = vector.broadcast %141 : vector<16x1xf32> to vector<16x32xf32>
    %143 = arith.mulf %138, %142 : vector<16x32xf32>
    %cst_57 = arith.constant dense<0.000000e+00> : vector<16x8xf32>
    %144 = tpu.matmul %143, %132, %cst_57 {dimension_numbers = #tpu.dot_dimension_numbers<[1], [0], [0], [1], [0, 0, 1, 1], [], []>} : vector<16x32xf32>, vector<32x8xf32>, vector<16x8xf32> -> vector<16x8xf32>
    %145 = arith.truncf %144 : vector<16x8xf32> to vector<16x8xbf16>
    %c48 = arith.constant 48 : index
    %c0_58 = arith.constant 0 : index
    %146 = vector.load %arg8[%c48, %c0_58] : memref<64x64xbf16, #tpu.memory_space<vmem>>, vector<8x64xbf16>
    %cst_59 = arith.constant dense<0.000000e+00> : vector<16x64xf32>
    %147 = tpu.matmul %145, %146, %cst_59 {dimension_numbers = #tpu.dot_dimension_numbers<[1], [0], [0], [1], [0, 0, 1, 1], [], []>} : vector<16x8xbf16>, vector<8x64xbf16>, vector<16x64xf32> -> vector<16x64xf32>
    %148 = arith.addf %129, %147 : vector<16x64xf32>
    %149 = vector.extract_strided_slice %10 {offsets = [0, 56], sizes = [16, 8], strides = [1, 1]} : vector<16x64xf32> to vector<16x8xf32>
    %150 = vector.extract_strided_slice %12 {offsets = [0, 56], sizes = [32, 8], strides = [1, 1]} : vector<32x64xf32> to vector<32x8xf32>
    %151 = vector.extract_strided_slice %14 {offsets = [0, 56], sizes = [32, 8], strides = [1, 1]} : vector<32x64xf32> to vector<32x8xf32>
    "tpu.trace_start"() <{level = 10 : i32, message = "nd,md->nm"}> : () -> ()
    %cst_60 = arith.constant dense<0.000000e+00> : vector<16x32xf32>
    %152 = tpu.matmul %149, %150, %cst_60 {dimension_numbers = #tpu.dot_dimension_numbers<[1], [1], [0], [0], [0, 0, 1, 0], [], []>} : vector<16x8xf32>, vector<32x8xf32>, vector<16x32xf32> -> vector<16x32xf32>
    "tpu.trace_stop"() : () -> ()
    %cst_61 = arith.constant dense<0xFF800000> : vector<16xf32>
    %153 = vector.multi_reduction <maximumf>, %152, %cst_61 [1] : vector<16x32xf32> to vector<16xf32>
    %154 = vector.shape_cast %153 : vector<16xf32> to vector<16x1xf32>
    %155 = vector.broadcast %154 : vector<16x1xf32> to vector<16x32xf32>
    %156 = arith.subf %152, %155 : vector<16x32xf32>
    %157 = math.exp %156 : vector<16x32xf32>
    %cst_62 = arith.constant dense<0.000000e+00> : vector<16xf32>
    %158 = vector.multi_reduction <add>, %157, %cst_62 [1] : vector<16x32xf32> to vector<16xf32>
    %159 = vector.shape_cast %158 : vector<16xf32> to vector<16x1xf32>
    %160 = tpu.reciprocal %159 {approx = true} : vector<16x1xf32> -> vector<16x1xf32>
    %161 = vector.broadcast %160 : vector<16x1xf32> to vector<16x32xf32>
    %162 = arith.mulf %157, %161 : vector<16x32xf32>
    %cst_63 = arith.constant dense<0.000000e+00> : vector<16x8xf32>
    %163 = tpu.matmul %162, %151, %cst_63 {dimension_numbers = #tpu.dot_dimension_numbers<[1], [0], [0], [1], [0, 0, 1, 1], [], []>} : vector<16x32xf32>, vector<32x8xf32>, vector<16x8xf32> -> vector<16x8xf32>
    %164 = arith.truncf %163 : vector<16x8xf32> to vector<16x8xbf16>
    %c56 = arith.constant 56 : index
    %c0_64 = arith.constant 0 : index
    %165 = vector.load %arg8[%c56, %c0_64] : memref<64x64xbf16, #tpu.memory_space<vmem>>, vector<8x64xbf16>
    %cst_65 = arith.constant dense<0.000000e+00> : vector<16x64xf32>
    %166 = tpu.matmul %164, %165, %cst_65 {dimension_numbers = #tpu.dot_dimension_numbers<[1], [0], [0], [1], [0, 0, 1, 1], [], []>} : vector<16x8xbf16>, vector<8x64xbf16>, vector<16x64xf32> -> vector<16x64xf32>
    %167 = arith.addf %148, %166 : vector<16x64xf32>
    %c0_66 = arith.constant 0 : index
    %c0_67 = arith.constant 0 : index
    %168 = vector.load %arg9[%c0_66, %c0_67] : memref<1x64xf32, #tpu.memory_space<vmem>>, vector<1x64xf32>
    %169 = vector.broadcast %168 : vector<1x64xf32> to vector<16x64xf32>
    %170 = arith.addf %167, %169 : vector<16x64xf32>
    %c0_68 = arith.constant 0 : index
    %c0_69 = arith.constant 0 : index
    %c0_70 = arith.constant 0 : index
    %171 = vector.load %arg10[%c0_68, %c0_69, %c0_70] : memref<1x16x64xf32, #tpu.memory_space<vmem>>, vector<1x16x64xf32>
    %172 = vector.shape_cast %171 : vector<1x16x64xf32> to vector<16x64xf32>
    %173 = vector.shape_cast %170 : vector<16x64xf32> to vector<1x16x64xf32>
    tpu.vector_store %arg10[%c0_68, %c0_69, %c0_70], %173 {strides = array<i32>} : memref<1x16x64xf32, #tpu.memory_space<vmem>>, vector<1x16x64xf32>,
    return
  }
  func.func @transform_0(%arg0: i32, %arg1: i32) -> (i32, i32, i32) {
    %c0_i32 = arith.constant 0 : i32
    %c0_i32_0 = arith.constant 0 : i32
    return %arg0, %arg1, %c0_i32 : i32, i32, i32
  }
  func.func @transform_1(%arg0: i32, %arg1: i32) -> (i32, i32, i32) {
    %c0_i32 = arith.constant 0 : i32
    %c0_i32_0 = arith.constant 0 : i32
    %c0_i32_1 = arith.constant 0 : i32
    return %arg0, %c0_i32, %c0_i32_0 : i32, i32, i32
  }
  func.func @transform_2(%arg0: i32, %arg1: i32) -> (i32, i32, i32) {
    %c0_i32 = arith.constant 0 : i32
    %c0_i32_0 = arith.constant 0 : i32
    %c0_i32_1 = arith.constant 0 : i32
    return %arg0, %c0_i32, %c0_i32_0 : i32, i32, i32
  }
  func.func @transform_3(%arg0: i32, %arg1: i32) -> (i32, i32) {
    %c0_i32 = arith.constant 0 : i32
    %c0_i32_0 = arith.constant 0 : i32
    %c0_i32_1 = arith.constant 0 : i32
    return %c0_i32, %c0_i32_0 : i32, i32
  }
  func.func @transform_4(%arg0: i32, %arg1: i32) -> (i32, i32) {
    %c0_i32 = arith.constant 0 : i32
    %c0_i32_0 = arith.constant 0 : i32
    %c0_i32_1 = arith.constant 0 : i32
    return %c0_i32, %c0_i32_0 : i32, i32
  }
  func.func @transform_5(%arg0: i32, %arg1: i32) -> (i32, i32) {
    %c0_i32 = arith.constant 0 : i32
    %c0_i32_0 = arith.constant 0 : i32
    %c0_i32_1 = arith.constant 0 : i32
    return %c0_i32, %c0_i32_0 : i32, i32
  }
  func.func @transform_6(%arg0: i32, %arg1: i32) -> (i32, i32) {
    %c0_i32 = arith.constant 0 : i32
    %c0_i32_0 = arith.constant 0 : i32
    %c0_i32_1 = arith.constant 0 : i32
    return %c0_i32, %c0_i32_0 : i32, i32
  }
  func.func @transform_7(%arg0: i32, %arg1: i32) -> (i32, i32) {
    %c0_i32 = arith.constant 0 : i32
    %c0_i32_0 = arith.constant 0 : i32
    %c0_i32_1 = arith.constant 0 : i32
    return %c0_i32, %c0_i32_0 : i32, i32
  }
  func.func @transform_8(%arg0: i32, %arg1: i32) -> (i32, i32, i32) {
    %c0_i32 = arith.constant 0 : i32
    %c0_i32_0 = arith.constant 0 : i32
    return %arg0, %arg1, %c0_i32 : i32, i32, i32
  }
}

</mosaic_0001>

<bundles_post_ra>
// kernel: cross_attention_forward.1
= control target key start
LH: loop header
LB: loop body
LE: loop exit
PB: predicated region body
PF: predicated region fallthrough
CT: control target
= control target key end

     0   :  { %s4834_s0 = inlined_call_operand.hbm [shape: f32[2,16,48], index: 0, kind: input, shape index: {}]   ;;  %s4835_s1 = inlined_call_operand.hbm [shape: f32[2,32,40], index: 1, kind: input, shape index: {}]   ;;  %s4836_s2 = inlined_call_operand.hbm [shape: f32[2,32,40], index: 2, kind: input, shape index: {}]   ;;  %s4837_s3 = inlined_call_operand.hbm [shape: bf16[48,64], index: 3, kind: input, shape index: {}]   ;;  %s4838_s4 = inlined_call_operand.hbm [shape: bf16[40,64], index: 4, kind: input, shape index: {}]   ;;  %s4839_s5 = inlined_call_operand.hbm [shape: bf16[40,64], index: 5, kind: input, shape index: {}]   ;;  %s4840_s6 = inlined_call_operand.hbm [shape: bf16[64,64], index: 6, kind: input, shape index: {}]   ;;  %s4841_s7 = inlined_call_operand.hbm [shape: f32[1,64], index: 7, kind: input, shape index: {}]   ;;  %s4842_s8 = inlined_call_operand.hbm [shape: f32[2,16,64], index: 8, kind: output, shape index: {}]  }
   0x1   :  { %4859 = sst [smem:[#allocation31_spill]] %s4835_s1 }
   0x2   :  { %4860 = sst [smem:[#allocation32_spill]] %s4837_s3 }
   0x3   :  { %4861 = sst [smem:[#allocation33_spill]] %s4839_s5 }
   0x4   :  { %4862 = sst [smem:[#allocation34_spill]] %s4842_s8 }
   0x5   :  { %13 = vsyncpa [#allocation3], 0 }
   0x6   :  { %15 = vsyncpa [#allocation3 + $0x1], 0 }
   0x7   :  { %16 = vsyncpa [#allocation6], 0 }
   0x8   :  { %18 = vsyncpa [#allocation6 + $0x1], 0 }
   0x9   :  { %19 = vsyncpa [#allocation9], 0 }
   0xa   :  { %20 = vsyncpa [#allocation12], 0 }
   0xb   :  { %21 = vsyncpa [#allocation15], 0 }
   0xc   :  { %22 = vsyncpa [#allocation4], 0 }
   0xd   :  { %24 = vsyncpa [#allocation4 + $0x1], 0  ;;  %s4143_s27 = smov 0   ;;  %s4145_s28 = smov 0  }
   0xe   :  { %s4147_s29 = smov 0   ;;  %s4149_s30 = smov 0  }
   0xf   :  { %s4151_s9 = smov 0   ;;  %s4153_s10 = smov 0  }
  0x10 LB: > { %4863 = sst [smem:[#allocation23_spill]] %s4052_s27  ;;  %s4174_s11 = sadd.s32 4294967295, %s4072_s10   ;;  %s4072_s10 = sphi %s4153_s10, %s30_s10   ;;  %s4068_s9 = sphi %s4151_s9, %s4906_s9   ;;  %s4064_s30 = sphi %s4149_s30, %s4905_s30   ;;  %s4060_s29 = sphi %s4147_s29, %s4901_s29   ;;  %s4056_s28 = sphi %s4145_s28, %s4904_s28   ;;  %s4052_s27 = sphi %s4143_s27, %s4903_s27  }
  0x11   : > { %4864 = sst [smem:[#allocation24_spill]] %s4060_s29  ;;  %p3047_p0 = scmp.ge.s32.totalorder %s4072_s10, 1 }
  0x12   : > { %4865 = sst [smem:[#allocation25_spill]] %s4064_s30  ;;  %p4854_p1 = scmp.eq.s32.totalorder %s4174_s11, 0 }
  0x13   : > { %4866 = sst [smem:[#allocation26_spill]] %s4072_s10  ;;  %p247_p2 = scmp.eq.s32.totalorder %s4174_s11, 1 }
  0x14   : > { %p260_p3 = scmp.lt.s32.totalorder %s4072_s10, 3  ;;  %s4074_s13 = smov [#allocation8]  }
  0x15   : > { %s272_s14 = sshll.u32 %s4074_s13, 4  ;;  %s4075_s16 = smov [#allocation11]   ;;  %s273_s14 = int_to_ptr.vmem [resolvable:$true] %s272_s14 }
  0x16   : > { %p4180_p4 = pnand %p3047_p0, %p260_p3  ;;  %s298_s17 = sshll.u32 %s4075_s16, 4  ;;  %s299_s17 = int_to_ptr.vmem [resolvable:$true] %s298_s17 }
  0x17   : > { %s3773_s19 = scalar_lea.vmem %s273_s14, 384  ;;  %p3781_p12 = scmp.lt.s32.totalorder %s273_s14, %s273_s14 }
  0x18   : > { %s4867_s12 = scalar_select %p4180_p4, 1, 0 }
  0x19   : > { %p3579_p5 = pneg %p4180_p4  ;;  %p3774_p9 = scmp.ne.s32.totalorder %s273_s14, %s3773_s19 }
  0x1a   : > { %p3782_p13 = scmp.lt.s32.totalorder %s3773_s19, %s3773_s19 }
  0x1b   : > { %p4189_p7 = pnand %p3579_p5, %p4854_p1 }
  0x1c   : > { %p3783_p0 = por %p3782_p13, %p3781_p12 }
  0x1d   : > { %p4195_p8 = pneg %p4189_p7 }
  0x1f   : > { %p3776_p10 = pnand %p3774_p9, %p4195_p8 }
  0x21   : > { %p3777_p11 = pneg %p3776_p10 }
  0x23   : > { %p3784_p3 = pnand %p3783_p0, %p3777_p11 }
  0x25   : > { %3787 = shalt.err (!%p3784_p3)
}
  0x26   : > { %s4844_s20 = smov 64   ;;  %s4846_s21 = smov 4  }
  0x27   : > { %s4870_s3 = sld [smem:[#allocation32_spill]]  ;;  %s3799_s24 = scalar_lea.vmem %s299_s17, 320 }
  0x28   : > { %p3800_p5 = scmp.ne.s32.totalorder %s299_s17, %s3799_s24  ;;  %p3807_p12 = scmp.lt.s32.totalorder %s299_s17, %s299_s17 }
  0x29   : > { %p3808_p11 = scmp.lt.s32.totalorder %s3799_s24, %s3799_s24 }
  0x2a   : > { %p3802_p9 = pnand %p3800_p5, %p4195_p8 }
  0x2b   : > { %p3809_p13 = por %p3808_p11, %p3807_p12 }
  0x2c   : > { %p3803_p10 = pneg %p3802_p9 }
  0x2d   : > { %3582 = dma.hbm_to_vmem [thread:$0]  (!%p4189_p7), %s4870_s3, 384, %s273_s14, [#allocation9], %s4844_s20, %s4844_s20, %s4846_s21  }
  0x2e   : > { %p3810_p0 = pnand %p3809_p13, %p3803_p10 }
  0x30   : > { %3813 = shalt.err (!%p3810_p0)
}
  0x31   : > { %s4871_s5 = sld [smem:[#allocation33_spill]]  ;;  %s3046_s13 = sadd.s32 4294967294, %s4072_s10  }
  0x32   : > { %s42_s14 = sadd.s32 1, %s4068_s9  ;;  %s51_s16 = sadd.s32 1, %s4060_s29 }
  0x33   : > { %p44_p3 = scmp.ge.s32.totalorder %s42_s14, 2  ;;  %p58_p5 = scmp.ne.s32.totalorder %s4060_s29, %s4056_s28 }
  0x34   : > { %p59_p9 = scmp.eq.s32.totalorder %s4072_s10, 0  ;;  %p64_p10 = scmp.ne.s32.totalorder %s4056_s28, %s4052_s27 }
  0x35   : > { %s4908_s14 = smov (%p44_p3, %s42_s14), 0  ;;  %p4239_p13 = por %p247_p2, %p58_p5 }
  0x36   : > { %4872 = sst [smem:[#allocation27_spill]] %s4908_s14  ;;  %p60_p12 = por %p59_p9, %p58_p5 }
  0x37   : > { %3588 = dma.hbm_to_vmem [thread:$0]  (!%p4189_p7), %s4871_s5, 320, %s299_s17, [#allocation12], %s4844_s20, %s4844_s20, %s4846_s21  }
  0x38   : > { %p4231_p11 = por %p4854_p1, %p64_p10  ;;  %s46_s17 = ssub.s32 %s4068_s9, %s4908_s14 }
  0x39   : > { %s4874_s22 = scalar_select %p4239_p13, 1, 0 }
  0x3a   : > { %p49_p0 = scmp.eq.s32.totalorder %s46_s17, 0  ;;  %p253_p6 = scmp.eq.s32.totalorder %s3046_s13, 1 }
  0x3b   : > { %4875 = sst [smem:[#allocation28_spill]] %s4874_s22  ;;  %p3614_p4 = scmp.lt.s32.totalorder %s4072_s10, 2 }
  0x3c   : > { %s4245_s23 = sand.u32 1, %s4060_s29   ;;  %p4250_p3 = por %p253_p6, %p64_p10 }
  0x3d   : > { %s4248_s24 = scalar_select %p49_p0, %s4060_s29, %s51_s16  }
  0x3e   : > { %s4877_s25 = scalar_select %p4250_p3, 1, 0 }
  0x3f   : > { %4876 = sst [smem:[#allocation29_spill]] %s4248_s24  ;;  %p4254_p9 = pnand %p3614_p4, %p60_p12 }
  0x40   : > { %4878 = sst [smem:[#allocation30_spill]] %s4877_s25  ;;  %s359_s20 = sand.u32 1, %s4072_s10  }
  0x41   : > { %s3057_s21 = sshll.u32 %s4245_s23, 5  ;;  %s3166_s17 = sshll.u32 %s4068_s9, 9 }
  0x42   : > { %s4880_s1 = sld [smem:[#allocation31_spill]]  ;;  %s363_s14 = scalar_lea.vmem [#allocation5], %s3057_s21 }
  0x43   : > { %s370_s16 = sshll.u32 %s363_s14, 4  ;;  %s4264_s24 = scalar_lea.sflag [#allocation6], %s359_s20  ;;  %s371_s16 = int_to_ptr.vmem [resolvable:$true] %s370_s16 }
  0x44   : > { %p4858_p2 = pneg %p4254_p9  ;;  %s3827_s29 = scalar_lea.vmem %s371_s16, 512 }
  0x45   : > { %p3828_p4 = scmp.ne.s32.totalorder %s371_s16, %s3827_s29  ;;  %s4078_s10 = smov [#allocation5]  }
  0x46   : > { %s3832_s25 = sshll.u32 %s4078_s10, 4  ;;  %s3833_s25 = int_to_ptr.vmem [resolvable:$false] %s3832_s25 }
  0x47   : > { %p3830_p6 = pnand %p3828_p4, %p4858_p2  ;;  %s3834_s27 = scalar_lea.vmem %s3833_s25, 1024 }
  0x48   : > { %s369_s5 = scalar_lea.hbm %s4880_s1, %s3166_s17  ;;  %p3835_p10 = scmp.lt.s32.totalorder %s371_s16, %s3833_s25 }
  0x49   : > { %p3831_p5 = pneg %p3830_p6  ;;  %p3836_p12 = scmp.lt.s32.totalorder %s3834_s27, %s3827_s29 }
  0x4b   : > { %p3837_p0 = por %p3836_p12, %p3835_p10 }
  0x4d   : > { %p3838_p1 = pnand %p3837_p0, %p3831_p5 }
  0x4f   : > { %3841 = shalt.err (!%p3838_p1)
}
  0x50   : > { %s4079_s3 = smov 128   ;;  %s4080_s20 = smov 8  }
  0x51   : > { %3601 = dma.hbm_to_vmem [thread:$0]  (!%p4254_p9), %s369_s5, 512, %s371_s16, %s4264_s24, %s4079_s3, %s4079_s3, %s4080_s20  }
  0x52   : > { %s4280_s10 = scalar_lea.hbm %s4836_s2, %s3166_s17  ;;  %s384_s25 = scalar_lea.vmem [#allocation7], %s3057_s21 }
  0x53   : > { %s391_s27 = sshll.u32 %s384_s25, 4  ;;  %s4081_s29 = smov [#allocation10]   ;;  %s4282_s27 = int_to_ptr.vmem [resolvable:$true] %s391_s27 }
  0x54   : > { %s285_s1 = sshll.u32 %s4081_s29, 4  ;;  %s4082_s8 = smov [#allocation13]   ;;  %s286_s1 = int_to_ptr.vmem [resolvable:$true] %s285_s1 }
  0x55   : > { %s311_s22 = sshll.u32 %s4082_s8, 4  ;;  %s3853_s30 = scalar_lea.vmem %s286_s1, 320  ;;  %s312_s22 = int_to_ptr.vmem [resolvable:$true] %s311_s22 }
  0x56   : > { %p3854_p1 = scmp.ne.s32.totalorder %s286_s1, %s3853_s30  ;;  %p3861_p5 = scmp.lt.s32.totalorder %s286_s1, %s286_s1 }
  0x57   : > { %p3862_p10 = scmp.lt.s32.totalorder %s3853_s30, %s3853_s30 }
  0x58   : > { %p3856_p4 = pnand %p3854_p1, %p4195_p8 }
  0x59   : > { %p3863_p12 = por %p3862_p10, %p3861_p5 }
  0x5a   : > { %p3857_p6 = pneg %p3856_p4 }
  0x5c   : > { %p3864_p0 = pnand %p3863_p12, %p3857_p6 }
  0x5e   : > { %3867 = shalt.err (!%p3864_p0)
}
  0x5f   : > { %s4881_s5 = smov 4   ;;  %s4882_s21 = smov 64  }
  0x60   : > { %3585 = dma.hbm_to_vmem [thread:$0]  (!%p4189_p7), %s4838_s4, 320, %s286_s1, [#allocation9], %s4882_s21, %s4882_s21, %s4881_s5  }
  0x61   : > { %s3879_s8 = scalar_lea.vmem %s312_s22, 512  ;;  %p3887_p3 = scmp.lt.s32.totalorder %s312_s22, %s312_s22 }
  0x62   : > { %p3880_p2 = scmp.ne.s32.totalorder %s312_s22, %s3879_s8  ;;  %p3888_p5 = scmp.lt.s32.totalorder %s3879_s8, %s3879_s8 }
  0x64   : > { %p3882_p1 = pnand %p3880_p2, %p4195_p8  ;;  %p3889_p6 = por %p3888_p5, %p3887_p3 }
  0x66   : > { %p3883_p4 = pneg %p3882_p1 }
  0x68   : > { %p3890_p10 = pnand %p3889_p6, %p3883_p4 }
  0x6a   : > { %3893 = shalt.err (!%p3890_p10)
}
  0x6b   : > { %3591 = dma.hbm_to_vmem [thread:$0]  (!%p4189_p7), %s4840_s6, 512, %s312_s22, [#allocation12], %s4882_s21, %s4882_s21, %s4881_s5  }
  0x6c   : > { %s4083_s1 = smov [#allocation14]   ;;  %s3054_s25 = sshll.u32 %s4245_s23, 4 }
  0x6d   : > { %s325_s13 = sshll.u32 %s4083_s1, 4  ;;  %s326_s13 = int_to_ptr.vmem [resolvable:$true] %s325_s13 }
  0x6e   : > { %s3905_s29 = scalar_lea.vmem %s326_s13, 16  ;;  %s3912_s17 = scalar_lea.vmem %s326_s13, 32 }
  0x6f   : > { %p3906_p2 = scmp.ne.s32.totalorder %s326_s13, %s3905_s29  ;;  %p3913_p0 = scmp.lt.s32.totalorder %s326_s13, %s326_s13 }
  0x70   : > { %p3914_p1 = scmp.lt.s32.totalorder %s3912_s17, %s3905_s29 }
  0x71   : > { %p3908_p3 = pnand %p3906_p2, %p4195_p8 }
  0x72   : > { %p3915_p4 = por %p3914_p1, %p3913_p0 }
  0x73   : > { %p3909_p12 = pneg %p3908_p3 }
  0x75   : > { %p3916_p5 = pnand %p3915_p4, %p3909_p12 }
  0x77   : > { %3919 = shalt.err (!%p3916_p5)
}
  0x78   : > { %3594 = dma.hbm_to_vmem [thread:$0]  (!%p4189_p7), %s4841_s7, 16, %s326_s13, [#allocation15]  }
  0x79   : > { %s3165_s22 = sshll.u32 %s4068_s9, 8  ;;  %s340_s30 = scalar_lea.vmem [#allocation2], %s3054_s25 }
  0x7a   : > { %s348_s21 = scalar_lea.hbm %s4834_s0, %s3165_s22  ;;  %s349_s14 = sshll.u32 %s340_s30, 4  ;;  %s350_s14 = int_to_ptr.vmem [resolvable:$true] %s349_s14 }
  0x7b   : > { %s337_s1 = scalar_lea.sflag [#allocation3], %s4245_s23  ;;  %s3933_s29 = scalar_lea.vmem %s350_s14, 256 }
  0x7c   : > { %p3934_p8 = scmp.ne.s32.totalorder %s350_s14, %s3933_s29  ;;  %p4883_p6 = pneg %p4254_p9 }
  0x7d   : > { %s4084_s15 = smov [#allocation2]  }
  0x7e   : > { %p3936_p10 = pnand %p3934_p8, %p4883_p6  ;;  %s3938_s17 = sshll.u32 %s4084_s15, 4  ;;  %s3939_s17 = int_to_ptr.vmem [resolvable:$false] %s3938_s17 }
  0x7f   : > { %s3940_s16 = scalar_lea.vmem %s3939_s17, 512  ;;  %p3941_p7 = scmp.lt.s32.totalorder %s350_s14, %s3939_s17 }
  0x80   : > { %p3937_p2 = pneg %p3936_p10  ;;  %p3942_p3 = scmp.lt.s32.totalorder %s3940_s16, %s3933_s29 }
  0x82   : > { %p3943_p12 = por %p3942_p3, %p3941_p7 }
  0x84   : > { %p3944_p0 = pnand %p3943_p12, %p3937_p2 }
  0x86   : > { %3947 = shalt.err (!%p3944_p0)
}
  0x87   : > { %3598 = dma.hbm_to_vmem [thread:$0]  (!%p4254_p9), %s348_s21, 256, %s350_s14, %s337_s1, %s4079_s3, %s4079_s3, %s4080_s20  }
  0x88   : > { %s3961_s23 = scalar_lea.vmem %s4282_s27, 512  ;;  %p4884_p4 = pmov %p4883_p6 }
  0x89   : > { %p3962_p1 = scmp.ne.s32.totalorder %s4282_s27, %s3961_s23  ;;  %s4085_s13 = smov [#allocation7]  }
  0x8a   : > { %s3966_s25 = sshll.u32 %s4085_s13, 4  ;;  %s3967_s25 = int_to_ptr.vmem [resolvable:$false] %s3966_s25 }
  0x8b   : > { %p3964_p5 = pnand %p3962_p1, %p4884_p4  ;;  %s3968_s8 = scalar_lea.vmem %s3967_s25, 1024 }
  0x8c   : > { %p3969_p6 = scmp.lt.s32.totalorder %s4282_s27, %s3967_s25  ;;  %p3970_p10 = scmp.lt.s32.totalorder %s3968_s8, %s3961_s23 }
  0x8d   : > { %p3965_p8 = pneg %p3964_p5 }
  0x8e   : > { %p3971_p2 = por %p3970_p10, %p3969_p6 }
  0x90   : > { %p3972_p7 = pnand %p3971_p2, %p3965_p8 }
  0x92   : > { %3975 = shalt.err (!%p3972_p7)
}
  0x93   : > { %3604 = dma.hbm_to_vmem [thread:$0]  (!%p4254_p9), %s4280_s10, 512, %s4282_s27, %s4264_s24, %s4079_s3, %s4079_s3, %s4080_s20  }
  0x94   : > { %p4885_p3 = scmp.ne.s32.totalorder %s4867_s12, 0 }
  0x95   : > { %s4342_s22 = sand.u32 (!%p4885_p3), 1, %s4056_s28  }
  0x96   : > { %403 = sbr.rel (%p4885_p3) target bundleno = 5258 (0x148a), region = 52  ;;  %s3064_s5 = sshll.u32 (!%p4885_p3), %s4342_s22, 4 }
  0x97   : > { %s406_s18 = scalar_lea.sflag (!%p4885_p3), [#allocation3], %s4342_s22  ;;  %s4348_s26 = scalar_lea.vmem (!%p4885_p3), [#allocation2], %s3064_s5 }
  0x9b   : > { %4027 = dma.done.wait (%p4231_p11), %s406_s18, 256  }
  0x9c   : > { %4029 = vsyncadd (%p4231_p11), %s406_s18, 4294967040  ;;  %s414_s12 = sand.u32 1, %s4174_s11   ;;  %s3065_s24 = sshll.u32 %s4342_s22, 5 }
  0x9d   : > { %s415_s3 = scalar_lea.sflag [#allocation6], %s414_s12  ;;  %s4356_s20 = scalar_lea.vmem [#allocation5], %s3065_s24 }
  0x9e   : > { %4031 = dma.done.wait (%p4231_p11), %s415_s3, 1024  }
  0x9f   : > { %4033 = vsyncadd (%p4231_p11), %s415_s3, 4294966272  ;;  %s4362_s10 = scalar_lea.vmem [#allocation7], %s3065_s24  ;;  %p4886_p9 = scmp.eq.s32.totalorder %s4174_s11, 0 }
  0xa1   : > { %4035 = dma.done.wait (%p4886_p9), [#allocation9], 704   ;;  %p4887_p12 = pmov %p4886_p9 }
  0xa2   : > { %p4888_p0 = pmov %p4886_p9 }
  0xa3   : > { %4037 = vsyncadd (%p4887_p12), [#allocation9], 4294966592 }
  0xa4   : > { %4039 = dma.done.wait (%p4888_p0), [#allocation12], 832   ;;  %p4889_p1 = pmov %p4888_p0 }
  0xa5   : > { %p4890_p4 = pmov %p4888_p0 }
  0xa6   : > { %4041 = vsyncadd (%p4889_p1), [#allocation12], 4294966464 }
  0xa7   : > { %4043 = dma.done.wait (%p4890_p4), [#allocation15], 16   ;;  %p4891_p5 = pmov %p4888_p0 }
  0xa8   : > { %v4086_v0 = vmov 0.0   ;;  %vm4087_vm0 = vmmov 0   ;;  %vm604_vm1 = vcmask 1043456   ;;  %v3689_v1 = vld [vmem:[#allocation10 + $0x10] ss:$0 sps:$4 sm:$0xff]   ;;  %v3690_v2 = vld [vmem:[#allocation10 + $0x8] sm:$0xff]  }
  0xa9   : > { %4045 = vsyncadd (%p4891_p5), [#allocation15], 4294967280  ;;  %3295 = vmatprep.subr.bf16.mxu0 %v4086_v0  ;;  %3301 = vmatprep.mubr.msk.bf16.mxu0 %vm4087_vm0, %v4086_v0  ;;  %v606_v3 = vsel %vm604_vm1, %v3689_v1, 0  ;;  %v3692_v4 = vld [vmem:[#allocation8 + $0x10] sm:$0xff]   ;;  %v496_v5 = vld [vmem:[%s4356_s20] sm:$0xff]  ;;  %vm597_vm2 = vcmask 326656  }
  0xaa   : > { %3549 = vmatprep.subr.msk.bf16.mxu1 %vm604_vm1, %v3689_v1  ;;  %v3691_v6 = vld [vmem:[#allocation10] sm:$0xff]   ;;  %v497_v7 = vld [vmem:[%s4356_s20 + $0x8] sm:$0xff]  ;;  %3296 = vmatpush3.bf16.msra.mxu0 %v3692_v4  ;;  %v498_v10 = vld [vmem:[%s4356_s20 + $0x10] sm:$0xff]  ;;  %vm532_vm3 = vcmask 392192   ;;  %vm735_vm4 = vcmask 64512   ;;  %s4088_s11 = smov 120  }
  0xab   : > { %3306 = vmatpush3.bf16.msra.mxu1 %v606_v3  ;;  %v500_v8 = vpack.c.bf16 %v497_v7, %v496_v5  ;;  %v3693_v9 = vld [vmem:[#allocation8 + $0x8] sm:$0xff]   ;;  %3297 = vmatprep.subr.bf16.mxu0 %v4086_v0  ;;  %v499_v11 = vld [vmem:[%s4356_s20 + $0x18] sm:$0xff]  ;;  %v3694_v12 = vld [vmem:[#allocation8] sm:$0xff]   ;;  %vm829_vm5 = vcmask 261120   ;;  %s4089_s19 = smov 112   ;;  %s4090_s27 = smov 104  }
  0xac   : > { %3307 = vmatprep.subr.bf16.mxu1 %v3690_v2  ;;  %v493_v13 = vld [vmem:[%s4348_s26] sm:$0xff]  ;;  %v494_v14 = vld [vmem:[%s4348_s26 + $0x8] sm:$0xff]  ;;  %v501_v15 = vpack.c.bf16 %v499_v11, %v498_v10  ;;  %s4091_s21 = smov 96   ;;  %s4092_s30 = smov 88   ;;  %vm2848_vm6 = vcmask 523264  }
  0xad   : > { %3311 = vmatprep.mubr.msk.bf16.mxu1 %vm597_vm2, %v500_v8  ;;  %v495_v16 = vpack.c.bf16 %v494_v14, %v493_v13  ;;  %v3695_v17 = vld [vmem:[#allocation11 + $0x10] ss:$0 sps:$4 sm:$0xff]   ;;  %v3696_v22 = vld [vmem:[#allocation11 + $0x8] sm:$0xff]   ;;  %v3697_v27 = vld [vmem:[#allocation11] sm:$0xff]   ;;  %s4093_s14 = smov 80   ;;  %s4094_s1 = smov 72  }
  0xae   : > { %3298 = vmatpush3.bf16.msra.mxu0 %v3693_v9  ;;  %v684_v19 = vsel %vm604_vm1, %v3695_v17, 0  ;;  %v502_v29 = vld [vmem:[%s4362_s10] sm:$0xff]  ;;  %v503_v30 = vld [vmem:[%s4362_s10 + $0x8] sm:$0xff]  ;;  %v504_v31 = vld [vmem:[%s4362_s10 + $0x10] sm:$0xff]  ;;  %s4892_s29 = sld [smem:[#allocation25_spill]]  ;;  %s489_s16 = scalar_lea.vmem [#allocation16], %s3064_s5 }
  0xaf   : > { %3308 = vmatpush3.bf16.msra.mxu1 %v3690_v2  ;;  %3299 = vmatprep.subr.bf16.mxu0 %v4086_v0  ;;  %v506_v32 = vpack.c.bf16 %v503_v30, %v502_v29  ;;  %v505_v33 = vld [vmem:[%s4362_s10 + $0x18] sm:$0xff]  ;;  %s2867_s23 = sshll.u32 %s489_s16, 4  ;;  %s4894_s8 = sld [smem:[#allocation34_spill]]  ;;  %s4786_s23 = int_to_ptr.vmem [resolvable:$true] %s2867_s23 }
  0xb0   : > { %3309 = vmatprep.subr.bf16.mxu1 %v3691_v6  ;;  %v507_v34 = vpack.c.bf16 %v505_v33, %v504_v31  ;;  %s2852_s26 = scalar_lea.sflag [#allocation4], %s4342_s22  ;;  %s3976_s5 = scalar_lea.vmem %s4786_s23, 256 }
  0xb1   : > { %p3977_p11 = scmp.ne.s32.totalorder %s4786_s23, %s3976_s5  ;;  %s4095_s12 = smov [#allocation16]  }
  0xb2   : > { %3300 = vmatpush3.bf16.msra.mxu0 %v3694_v12  ;;  %s3980_s24 = sshll.u32 %s4095_s12, 4  ;;  %s3981_s24 = int_to_ptr.vmem [resolvable:$false] %s3980_s24 }
  0xb3   : > { %3310 = vmatpush3.bf16.msra.mxu1 %v3691_v6  ;;  %3550 = vmatprep.subr.msk.bf16.mxu0 %vm604_vm1, %v3695_v17  ;;  %v934_v17 = vld [vmem:[#allocation13] sm:$0xf]  ;;  %p3978_p8 = pnand %p3977_p11, %p4239_p13  ;;  %s3982_s3 = scalar_lea.vmem %s3981_s24, 512 }
  0xb4   : > { %s3168_s17 = sshll.u32 %s4892_s29, 8  ;;  %p3983_p10 = scmp.lt.s32.totalorder %s4786_s23, %s3981_s24 }
  0xb5   : > { %3302 = vmatmul.mubr.msk.bf16.vlgmr.msra.gmra.mxu0 %vm532_vm3, %v495_v16  ;;  %s4784_s18 = scalar_lea.hbm %s4894_s8, %s3168_s17  ;;  %p3979_p6 = pneg %p3978_p8 }
  0xb6   : > { %3312 = vmatmul.mubr.msk.bf16.vlgmr.msra.gmra.mxu1 %vm597_vm2, %v501_v15  ;;  %3316 = vmatpush3.bf16.msra.mxu0 %v684_v19  ;;  %v1206_v19 = vsel %vm604_vm1, %v934_v17, 0  ;;  %p3984_p2 = scmp.lt.s32.totalorder %s3982_s3, %s3976_s5 }
  0xb7   : > { %3317 = vmatprep.subr.bf16.mxu0 %v3696_v22  ;;  %3321 = vmatprep.mubr.msk.bf16.mxu0 %vm597_vm2, %v506_v32  ;;  %v1154_v32 = vld [vmem:[#allocation13 + $0x4] sm:$0xf] }
  0xb8   : > { %p3985_p7 = por %p3984_p2, %p3983_p10 }
  0xba   : > { %3318 = vmatpush3.bf16.msra.mxu0 %v3696_v22  ;;  %p3986_p3 = pnand %p3985_p7, %p3979_p6 }
  0xbb   : > { %3319 = vmatprep.subr.bf16.mxu0 %v3697_v27 }
  0xbe   : > { %3320 = vmatpush3.bf16.msra.mxu0 %v3697_v27 }
  0xc1   : > { %3322 = vmatmul.mubr.msk.bf16.vlgmr.msra.gmra.mxu0 %vm597_vm2, %v507_v34 }
 0x175   : > { %v4397_v21 = vpop.f32.mrf.mxu0 }
 0x176   : > { %v4391_v18 = vpop.f32.mrf.mxu1  ;;  %3333 = vmatprep.mubr.msk.f32.mxu1 %vm735_vm4, %v4397_v21 }
 0x177   : > { %v3303_v24 = vpop.f32.mrf.mxu0 }
 0x178   : > { %v4395_v20 = vpop.f32.mrf.mxu1 }
 0x179   : > { %v4411_v26 = vpop.f32.mrf.mxu0 }
 0x17a   : > { %v4401_v23 = vpop.f32.mrf.mxu1 }
 0x17b   : > { %945 = vrot.lane.b32.xlu0 %v4401_v23, %s4088_s11  ;;  %3325 = vmatprep.subr.msk.mxu1 %vm735_vm4, %v4401_v23  ;;  %v3304_v28 = vpop.f32.mrf.mxu0 }
 0x17c   : > { %v4407_v25 = vpop.f32.mrf.mxu1  ;;  %3326 = vmatpush3.xpose.msk.msra.mxu1 %vm735_vm4, %v4401_v23 }
 0x17d   : > { %3327 = vmatprep.subr.msk.mxu1 %vm735_vm4, %v4391_v18  ;;  %941 = vrot.lane.b32.xlu1 %v4407_v25, %s4088_s11 }
 0x17f   : > { %943 = vrot.lane.b32.xlu0 %v4391_v18, %s4088_s11 }
 0x180   : > { %3328 = vmatpush3.xpose.msk.msra.mxu1 %vm735_vm4, %v4391_v18 }
 0x181   : > { %939 = vrot.lane.b32.xlu1 %v4395_v20, %s4088_s11  ;;  %3329 = vmatprep.subr.msk.mxu1 %vm735_vm4, %v4407_v25  ;;  %v4456_v41 = vpop.f32.mrf.mxu0 }
 0x183   : > { %935 = vrot.lane.b32.xlu0 %v4397_v21, %s4088_s11  ;;  %v4458_v42 = vpop.f32.mrf.mxu0 }
 0x184   : > { %3330 = vmatpush3.xpose.msk.msra.mxu1 %vm735_vm4, %v4407_v25 }
 0x185   : > { %3331 = vmatprep.subr.msk.mxu1 %vm735_vm4, %v4395_v20  ;;  %937 = vrot.lane.b32.xlu1 %v4411_v26, %s4088_s11  ;;  %v4460_v43 = vpop.f32.mrf.mxu0 }
 0x186   : > { %3336 = vmatprep.subr.mxu0 %v4460_v43 }
 0x187   : > { %3337 = vmatpush3.msra.mxu0 %v4460_v43  ;;  %v4470_v48 = vpop.f32.mrf.mxu0 }
 0x188   : > { %3332 = vmatpush3.xpose.msk.msra.mxu1 %vm735_vm4, %v4395_v20  ;;  %3338 = vmatprep.subr.mxu0 %v4456_v41 }
 0x189   : > { %3339 = vmatpush3.msra.mxu0 %v4456_v41 }
 0x18a   : > { %3340 = vmatprep.subr.mxu0 %v4470_v48 }
 0x18b   : > { %3334 = vmatmul.mubr.msk.f32.vlgmr.msra.gmra.mxu1 %vm735_vm4, %v4411_v26  ;;  %3341 = vmatpush3.msra.mxu0 %v4470_v48 }
 0x18c   : > { %3342 = vmatprep.subr.mxu0 %v4458_v42 }
 0x18d   : > { %3343 = vmatpush3.msra.mxu0 %v4458_v42 }
 0x1ed   : > { %v946_v35 = vpop.permute.xlu0 %945 }
 0x1ee   : > { %3347 = vmatprep.subr.msk.mxu1 %vm735_vm4, %v946_v35 }
 0x1ef   : > { %3348 = vmatpush3.xpose.msk.msra.mxu1 %vm735_vm4, %v946_v35  ;;  %v942_v36 = vpop.permute.xlu1 %941  ;;  %v1159_v35 = vsel %vm604_vm1, %v1154_v32, 0 }
 0x1f1   : > { %v944_v37 = vpop.permute.xlu0 %943 }
 0x1f2   : > { %3349 = vmatprep.subr.msk.mxu1 %vm735_vm4, %v944_v37 }
 0x1f3   : > { %3350 = vmatpush3.xpose.msk.msra.mxu1 %vm735_vm4, %v944_v37  ;;  %v940_v39 = vpop.permute.xlu1 %939 }
 0x1f4   : > { %3351 = vmatprep.subr.msk.mxu1 %vm735_vm4, %v942_v36 }
 0x1f5   : > { %v936_v38 = vpop.permute.xlu0 %935 }
 0x1f6   : > { %3355 = vmatprep.mubr.msk.f32.mxu1 %vm735_vm4, %v936_v38 }
 0x1f7   : > { %3352 = vmatpush3.xpose.msk.msra.mxu1 %vm735_vm4, %v942_v36  ;;  %v938_v40 = vpop.permute.xlu1 %937 }
 0x1f8   : > { %3353 = vmatprep.subr.msk.mxu1 %vm735_vm4, %v940_v39 }
 0x1fb   : > { %3354 = vmatpush3.xpose.msk.msra.mxu1 %vm735_vm4, %v940_v39 }
 0x1fc   : > { %3375 = vmatprep.subr.bf16.mxu1 %v4086_v0 }
 0x1fe   : > { %3356 = vmatmul.mubr.msk.f32.vlgmr.msra.gmra.mxu1 %vm735_vm4, %v938_v40 }
 0x1ff   : > { %3377 = vmatprep.mubr.msk.bf16.mxu1 %vm4087_vm0, %v4086_v0  ;;  %3376 = vmatpush3.bf16.msra.mxu1 %v1206_v19 }
 0x24b   : > { %v3335_v44 = vpop.f32.mrf.mxu1 }
 0x24c   : > { %v833_v45 = vsel %vm829_vm5, %v3335_v44, -inf }
 0x24d   : > { %834 = vmax.xlane.f32.xlu1 %v833_v45  ;;  %v820_v46 = vpop.f32.mrf.mxu1 }
 0x24e   : > { %v830_v47 = vsel %vm829_vm5, %v820_v46, -inf }
 0x24f   : > { %831 = vmax.xlane.f32.xlu0 %v830_v47 }
 0x25e   : > { %1066 = vrot.lane.b32.xlu1 %v4460_v43, %s4088_s11 }
 0x2be   : > { %v3357_v49 = vpop.f32.mrf.mxu1 }
 0x2bf   : > { %v1037_v52 = vsel %vm829_vm5, %v3357_v49, -inf }
 0x2c0   : > { %v1025_v50 = vpop.f32.mrf.mxu1 }
 0x2c1   : > { %v1034_v51 = vsel %vm829_vm5, %v1025_v50, -inf }
 0x2c2   : > { %1035 = vmax.xlane.f32.xlu0 %v1034_v51 }
 0x2c6   : > { %1038 = vmax.xlane.f32.xlu0 %v1037_v52 }
 0x2d6   : > { %v835_v53 = vpop.xlane.xlu1 %834 }
 0x2d7   : > { %v837_v54 = vsub.f32 %v3335_v44, %v835_v53 }
 0x2d8   : > { %v832_v55 = vpop.xlane.xlu0 %831 }
 0x2d9   : > { %v840_v56 = vmul.f32 1.442695, %v837_v54  ;;  %v836_v57 = vsub.f32 %v820_v46, %v832_v55 }
 0x2da   : > { %v1067_v63 = vpop.permute.xlu1 %1066 }
 0x2db   : > { %3698 = vpow2.f32 %v840_v56  ;;  %v838_v58 = vmul.f32 1.442695, %v836_v57  ;;  %3358 = vmatprep.subr.mxu0 %v1067_v63 }
 0x2dd   : > { %3700 = vpow2.f32 %v838_v58 }
 0x2e8   : > { %v3699_v59 = vpop.eup %3698 }
 0x2e9   : > { %v845_v60 = vsel %vm829_vm5, %v3699_v59, 0.0 }
 0x2ea   : > { %v3701_v61 = vpop.eup %3700  ;;  %846 = vadd.xlane.f32.xlu0 %v845_v60 }
 0x2eb   : > { %v842_v62 = vsel %vm829_vm5, %v3701_v61, 0.0 }
 0x2ec   : > { %843 = vadd.xlane.f32.xlu1 %v842_v62 }
 0x2fd   : > { %1062 = vrot.lane.b32.xlu1 %v4470_v48, %s4088_s11 }
 0x34b   : > { %v1036_v1 = vpop.xlane.xlu0 %1035 }
 0x34c   : > { %v1040_v2 = vsub.f32 %v1025_v50, %v1036_v1 }
 0x34e   : > { %v1042_v3 = vmul.f32 1.442695, %v1040_v2 }
 0x34f   : > { %v1039_v4 = vpop.xlane.xlu0 %1038 }
 0x350   : > { %3702 = vpow2.f32 %v1042_v3  ;;  %v1041_v5 = vsub.f32 %v3357_v49, %v1039_v4 }
 0x352   : > { %v1044_v6 = vmul.f32 1.442695, %v1041_v5 }
 0x354   : > { %3704 = vpow2.f32 %v1044_v6 }
 0x35d   : > { %v3703_v7 = vpop.eup %3702 }
 0x35e   : > { %v1046_v8 = vsel %vm829_vm5, %v3703_v7, 0.0 }
 0x35f   : > { %1047 = vadd.xlane.f32.xlu1 %v1046_v8 }
 0x361   : > { %v3705_v9 = vpop.eup %3704 }
 0x362   : > { %v1049_v10 = vsel %vm829_vm5, %v3705_v9, 0.0 }
 0x363   : > { %1050 = vadd.xlane.f32.xlu0 %v1049_v10 }
 0x370   : > { %1060 = vrot.lane.b32.xlu1 %v4458_v42, %s4088_s11 }
 0x373   : > { %v847_v11 = vpop.xlane.xlu0 %846 }
 0x374   : > { %1257 = vrot.lane.b32.xlu1 %v4391_v18, %s4089_s19  ;;  %3706 = vrcp.f32 %v847_v11 }
 0x375   : > { %v844_v12 = vpop.xlane.xlu1 %843 }
 0x376   : > { %3708 = vrcp.f32 %v844_v12 }
 0x378   : > { %1253 = vrot.lane.b32.xlu1 %v4395_v20, %s4089_s19 }
 0x379   : > { %1064 = vrot.lane.b32.xlu0 %v4456_v41, %s4088_s11  ;;  %v1063_v22 = vpop.permute.xlu1 %1062 }
 0x37c   : > { %1251 = vrot.lane.b32.xlu1 %v4411_v26, %s4089_s19 }
 0x37d   : > { %1259 = vrot.lane.b32.xlu0 %v4401_v23, %s4089_s19 }
 0x380   : > { %1522 = vrot.lane.b32.xlu1 %v4391_v18, %s4090_s27 }
 0x381   : > { %1255 = vrot.lane.b32.xlu0 %v4407_v25, %s4089_s19  ;;  %v3707_v13 = vpop.eup %3706 }
 0x382   : > { %v851_v16 = vmul.f32 %v3707_v13, %v3699_v59 }
 0x383   : > { %v3709_v14 = vpop.eup %3708 }
 0x384   : > { %1518 = vrot.lane.b32.xlu1 %v4395_v20, %s4090_s27  ;;  %v850_v15 = vmul.f32 %v3709_v14, %v3701_v61 }
 0x385   : > { %1249 = vrot.lane.b32.xlu0 %v4397_v21, %s4089_s19 }
 0x386   : > { %3344 = vmatprep.mubr.msk.f32.mxu0 %vm829_vm5, %v850_v15 }
 0x387   : > { %3345 = vmatmul.mubr.msk.f32.vlgmr.msra.gmra.mxu0 %vm829_vm5, %v851_v16 }
 0x388   : > { %3359 = vmatpush3.msra.mxu0 %v1067_v63  ;;  %1516 = vrot.lane.b32.xlu1 %v4411_v26, %s4090_s27 }
 0x389   : > { %1524 = vrot.lane.b32.xlu0 %v4401_v23, %s4090_s27 }
 0x38d   : > { %1520 = vrot.lane.b32.xlu0 %v4407_v25, %s4090_s27 }
 0x391   : > { %1514 = vrot.lane.b32.xlu0 %v4397_v21, %s4090_s27 }
 0x3e8   : > { %v1048_v24 = vpop.xlane.xlu1 %1047 }
 0x3e9   : > { %3710 = vrcp.f32 %v1048_v24 }
 0x3ec   : > { %v1051_v27 = vpop.xlane.xlu0 %1050  ;;  %v1061_v29 = vpop.permute.xlu1 %1060 }
 0x3ed   : > { %3712 = vrcp.f32 %v1051_v27 }
 0x3f0   : > { %v1065_v28 = vpop.permute.xlu0 %1064  ;;  %v1258_v49 = vpop.permute.xlu1 %1257 }
 0x3f1   : > { %3360 = vmatprep.subr.mxu0 %v1065_v28 }
 0x3f2   : > { %3361 = vmatpush3.msra.mxu0 %v1065_v28 }
 0x3f3   : > { %3362 = vmatprep.subr.mxu0 %v1063_v22 }
 0x3f4   : > { %3363 = vmatpush3.msra.mxu0 %v1063_v22  ;;  %v1260_v36 = vpop.permute.xlu0 %1259  ;;  %v1254_v51 = vpop.permute.xlu1 %1253 }
 0x3f5   : > { %3364 = vmatprep.subr.mxu0 %v1061_v29 }
 0x3f6   : > { %v3711_v30 = vpop.eup %3710  ;;  %3365 = vmatpush3.msra.mxu0 %v1061_v29 }
 0x3f7   : > { %v1054_v31 = vmul.f32 %v3711_v30, %v3703_v7  ;;  %3369 = vmatprep.subr.bf16.mxu0 %v4086_v0 }
 0x3f8   : > { %v1256_v40 = vpop.permute.xlu0 %1255  ;;  %v1252_v53 = vpop.permute.xlu1 %1251 }
 0x3f9   : > { %3366 = vmatprep.mubr.msk.f32.mxu0 %vm829_vm5, %v1054_v31 }
 0x3fa   : > { %v3713_v33 = vpop.eup %3712 }
 0x3fb   : > { %v1055_v34 = vmul.f32 %v3713_v33, %v3705_v9 }
 0x3fc   : > { %v1250_v46 = vpop.permute.xlu0 %1249  ;;  %v1523_v55 = vpop.permute.xlu1 %1522 }
 0x3fd   : > { %3367 = vmatmul.mubr.msk.f32.vlgmr.msra.gmra.mxu0 %vm829_vm5, %v1055_v34 }
 0x3fe   : > { %3370 = vmatpush3.bf16.msra.mxu0 %v1159_v35  ;;  %3371 = vmatprep.mubr.msk.bf16.mxu0 %vm4087_vm0, %v4086_v0 }
 0x3ff   : > { %3381 = vmatprep.subr.msk.mxu0 %vm735_vm4, %v1260_v36 }
 0x400   : > { %v1525_v50 = vpop.permute.xlu0 %1524  ;;  %v1519_v56 = vpop.permute.xlu1 %1518 }
 0x404   : > { %v1521_v52 = vpop.permute.xlu0 %1520  ;;  %v1517_v57 = vpop.permute.xlu1 %1516 }
 0x408   : > { %v1515_v54 = vpop.permute.xlu0 %1514 }
 0x447   : > { %v3346_v37 = vpop.f32.mrf.mxu0 }
 0x449   : > { %v924_v38 = vpop.f32.mrf.mxu0 }
 0x44a   : > { %v933_v39 = vpack.c.bf16 %v3346_v37, %v924_v38 }
 0x44c   : > { %3378 = vmatmul.mubr.msk.bf16.vlgmr.msra.gmra.mxu1 %vm735_vm4, %v933_v39  ;;  %v1464_v39 = vld [vmem:[#allocation13 + $0x8] sm:$0xf] }
 0x4bd   : > { %v3368_v44 = vpop.f32.mrf.mxu0 }
 0x4bf   : > { %v1144_v45 = vpop.f32.mrf.mxu0 }
 0x4c0   : > { %v1153_v47 = vpack.c.bf16 %v3368_v44, %v1144_v45 }
 0x4c2   : > { %3372 = vmatmul.mubr.msk.bf16.vlgmr.msra.gmra.mxu0 %vm735_vm4, %v1153_v47 }
 0x4c3   : > { %3382 = vmatpush3.xpose.msk.msra.mxu0 %vm735_vm4, %v1260_v36  ;;  %3389 = vmatprep.mubr.msk.f32.mxu0 %vm735_vm4, %v1250_v46  ;;  %v1469_v46 = vsel %vm604_vm1, %v1464_v39, 0 }
 0x4c4   : > { %3383 = vmatprep.subr.msk.mxu0 %vm735_vm4, %v1258_v49 }
 0x4c7   : > { %3384 = vmatpush3.xpose.msk.msra.mxu0 %vm735_vm4, %v1258_v49 }
 0x4c8   : > { %3385 = vmatprep.subr.msk.mxu0 %vm735_vm4, %v1256_v40 }
 0x4cb   : > { %3386 = vmatpush3.xpose.msk.msra.mxu0 %vm735_vm4, %v1256_v40 }
 0x4cc   : > { %3387 = vmatprep.subr.msk.mxu0 %vm735_vm4, %v1254_v51 }
 0x4cf   : > { %3388 = vmatpush3.xpose.msk.msra.mxu0 %vm735_vm4, %v1254_v51 }
 0x4d0   : > { %3409 = vmatprep.subr.msk.mxu0 %vm735_vm4, %v1525_v50 }
 0x4d2   : > { %3390 = vmatmul.mubr.msk.f32.vlgmr.msra.gmra.mxu0 %vm735_vm4, %v1252_v53 }
 0x4d3   : > { %3410 = vmatpush3.xpose.msk.msra.mxu0 %vm735_vm4, %v1525_v50  ;;  %3417 = vmatprep.mubr.msk.f32.mxu0 %vm735_vm4, %v1515_v54 }
 0x4d4   : > { %3411 = vmatprep.subr.msk.mxu0 %vm735_vm4, %v1523_v55 }
 0x4d7   : > { %3412 = vmatpush3.xpose.msk.msra.mxu0 %vm735_vm4, %v1523_v55 }
 0x4d8   : > { %3413 = vmatprep.subr.msk.mxu0 %vm735_vm4, %v1521_v52 }
 0x4db   : > { %3414 = vmatpush3.xpose.msk.msra.mxu0 %vm735_vm4, %v1521_v52 }
 0x4dc   : > { %3415 = vmatprep.subr.msk.mxu0 %vm735_vm4, %v1519_v56 }
 0x4df   : > { %3416 = vmatpush3.xpose.msk.msra.mxu0 %vm735_vm4, %v1519_v56 }
 0x4e2   : > { %3418 = vmatmul.mubr.msk.f32.vlgmr.msra.gmra.mxu0 %vm735_vm4, %v1517_v57 }
 0x50c   : > { %v4543_v58 = vpop.f32.mrf.mxu1 }
 0x50e   : > { %v3379_v59 = vpop.f32.mrf.mxu1 }
 0x510   : > { %v4545_v60 = vpop.f32.mrf.mxu1 }
 0x512   : > { %v3380_v61 = vpop.f32.mrf.mxu1 }
 0x582   : > { %v4547_v62 = vpop.f32.mrf.mxu0 }
 0x584   : > { %v3373_v63 = vpop.f32.mrf.mxu0 }
 0x586   : > { %v4549_v1 = vpop.f32.mrf.mxu0 }
 0x588   : > { %v3374_v2 = vpop.f32.mrf.mxu0 }
 0x592   : > { %v3391_v3 = vpop.f32.mrf.mxu0 }
 0x593   : > { %v1351_v4 = vsel %vm829_vm5, %v3391_v3, -inf }
 0x594   : > { %1352 = vmax.xlane.f32.xlu1 %v1351_v4  ;;  %v1339_v5 = vpop.f32.mrf.mxu0  ;;  %v1729_v4 = vld [vmem:[#allocation13 + $0xc] sm:$0xf] }
 0x595   : > { %v1348_v6 = vsel %vm829_vm5, %v1339_v5, -inf }
 0x596   : > { %1349 = vmax.xlane.f32.xlu0 %v1348_v6 }
 0x5a2   : > { %v3419_v7 = vpop.f32.mrf.mxu0 }
 0x5a3   : > { %v1616_v8 = vsel %vm829_vm5, %v3419_v7, -inf }
 0x5a4   : > { %v1604_v31 = vpop.f32.mrf.mxu0 }
 0x5a5   : > { %1376 = vrot.lane.b32.xlu1 %v4460_v43, %s4089_s19  ;;  %v1613_v32 = vsel %vm829_vm5, %v1604_v31, -inf }
 0x5a9   : > { %1372 = vrot.lane.b32.xlu1 %v4470_v48, %s4089_s19 }
 0x5ad   : > { %1370 = vrot.lane.b32.xlu1 %v4458_v42, %s4089_s19 }
 0x5d1   : > { %1617 = vmax.xlane.f32.xlu1 %v1616_v8  ;;  %v1734_v8 = vsel %vm604_vm1, %v1729_v4, 0 }
 0x5e2   : > { %1641 = vrot.lane.b32.xlu1 %v4460_v43, %s4090_s27 }
 0x5e6   : > { %1637 = vrot.lane.b32.xlu1 %v4470_v48, %s4090_s27 }
 0x5ea   : > { %1635 = vrot.lane.b32.xlu1 %v4458_v42, %s4090_s27 }
 0x5ee   : > { %1787 = vrot.lane.b32.xlu1 %v4391_v18, %s4091_s21 }
 0x5f2   : > { %1783 = vrot.lane.b32.xlu1 %v4395_v20, %s4091_s21 }
 0x5f6   : > { %1781 = vrot.lane.b32.xlu1 %v4411_v26, %s4091_s21 }
 0x61d   : > { %v1353_v9 = vpop.xlane.xlu1 %1352 }
 0x61e   : > { %v1355_v10 = vsub.f32 %v3391_v3, %v1353_v9 }
 0x61f   : > { %v1350_v11 = vpop.xlane.xlu0 %1349 }
 0x620   : > { %v1358_v12 = vmul.f32 1.442695, %v1355_v10  ;;  %v1354_v13 = vsub.f32 %v1339_v5, %v1350_v11  ;;  %v1243_v10 = vadd.f32 %v4543_v58, %v4547_v62 }
 0x621   : > { %v1377_v14 = vpop.permute.xlu1 %1376 }
 0x622   : > { %3714 = vpow2.f32 %v1358_v12  ;;  %v1356_v15 = vmul.f32 1.442695, %v1354_v13  ;;  %3392 = vmatprep.subr.mxu1 %v1377_v14 }
 0x623   : > { %3393 = vmatpush3.msra.mxu1 %v1377_v14  ;;  %v1246_v14 = vadd.f32 %v4545_v60, %v4549_v1 }
 0x624   : > { %3716 = vpow2.f32 %v1356_v15 }
 0x625   : > { %v1373_v24 = vpop.permute.xlu1 %1372 }
 0x629   : > { %v1371_v27 = vpop.permute.xlu1 %1370 }
 0x62f   : > { %v3715_v16 = vpop.eup %3714 }
 0x630   : > { %v1363_v17 = vsel %vm829_vm5, %v3715_v16, 0.0 }
 0x631   : > { %v3717_v19 = vpop.eup %3716  ;;  %1364 = vadd.xlane.f32.xlu0 %v1363_v17 }
 0x632   : > { %v1360_v22 = vsel %vm829_vm5, %v3717_v19, 0.0 }
 0x635   : > { %1361 = vadd.xlane.f32.xlu0 %v1360_v22 }
 0x64b   : > { %1374 = vrot.lane.b32.xlu0 %v4456_v41, %s4089_s19 }
 0x65a   : > { %v1618_v28 = vpop.xlane.xlu1 %1617 }
 0x65b   : > { %v1620_v29 = vsub.f32 %v3419_v7, %v1618_v28 }
 0x65d   : > { %v1623_v30 = vmul.f32 1.442695, %v1620_v29 }
 0x65e   : > { %v1642_v47 = vpop.permute.xlu1 %1641 }
 0x65f   : > { %3718 = vpow2.f32 %v1623_v30 }
 0x662   : > { %v1638_v61 = vpop.permute.xlu1 %1637 }
 0x666   : > { %v1636_v2 = vpop.permute.xlu1 %1635 }
 0x66a   : > { %1614 = vmax.xlane.f32.xlu0 %v1613_v32  ;;  %v1788_v29 = vpop.permute.xlu1 %1787 }
 0x66c   : > { %v3719_v33 = vpop.eup %3718 }
 0x66d   : > { %v1628_v34 = vsel %vm829_vm5, %v3719_v33, 0.0 }
 0x66e   : > { %1629 = vadd.xlane.f32.xlu0 %v1628_v34  ;;  %v1784_v58 = vpop.permute.xlu1 %1783 }
 0x672   : > { %v1782_v60 = vpop.permute.xlu1 %1781 }
 0x6ba   : > { %v1365_v35 = vpop.xlane.xlu0 %1364 }
 0x6bb   : > { %3720 = vrcp.f32 %v1365_v35 }
 0x6be   : > { %v1362_v36 = vpop.xlane.xlu0 %1361 }
 0x6bf   : > { %3722 = vrcp.f32 %v1362_v36 }
 0x6c2   : > { %v1375_v37 = vpop.permute.xlu0 %1374 }
 0x6c3   : > { %3394 = vmatprep.subr.mxu1 %v1375_v37 }
 0x6c4   : > { %3395 = vmatpush3.msra.mxu1 %v1375_v37 }
 0x6c5   : > { %3396 = vmatprep.subr.mxu1 %v1373_v24 }
 0x6c6   : > { %3397 = vmatpush3.msra.mxu1 %v1373_v24 }
 0x6c7   : > { %3398 = vmatprep.subr.mxu1 %v1371_v27 }
 0x6c8   : > { %3399 = vmatpush3.msra.mxu1 %v1371_v27  ;;  %v3721_v38 = vpop.eup %3720 }
 0x6c9   : > { %3403 = vmatprep.subr.bf16.mxu1 %v4086_v0  ;;  %v1369_v45 = vmul.f32 %v3721_v38, %v3715_v16 }
 0x6cc   : > { %v3723_v40 = vpop.eup %3722 }
 0x6cd   : > { %v1368_v44 = vmul.f32 %v3723_v40, %v3717_v19 }
 0x6cf   : > { %3400 = vmatprep.mubr.msk.f32.mxu1 %vm829_vm5, %v1368_v44 }
 0x6d0   : > { %3401 = vmatmul.mubr.msk.f32.vlgmr.msra.gmra.mxu1 %vm829_vm5, %v1369_v45 }
 0x6d1   : > { %3404 = vmatpush3.bf16.msra.mxu1 %v1469_v46  ;;  %3405 = vmatprep.mubr.msk.bf16.mxu1 %vm4087_vm0, %v4086_v0 }
 0x6d2   : > { %3420 = vmatprep.subr.mxu1 %v1642_v47 }
 0x6f3   : > { %v1615_v49 = vpop.xlane.xlu0 %1614 }
 0x6f4   : > { %v1619_v50 = vsub.f32 %v1604_v31, %v1615_v49 }
 0x6f6   : > { %v1621_v51 = vmul.f32 1.442695, %v1619_v50 }
 0x6f7   : > { %v1630_v54 = vpop.xlane.xlu0 %1629 }
 0x6f8   : > { %3724 = vpow2.f32 %v1621_v51 }
 0x6f9   : > { %3726 = vrcp.f32 %v1630_v54 }
 0x705   : > { %v3725_v52 = vpop.eup %3724 }
 0x706   : > { %v1625_v53 = vsel %vm829_vm5, %v3725_v52, 0.0  ;;  %v3727_v3 = vpop.eup %3726 }
 0x707   : > { %1626 = vadd.xlane.f32.xlu0 %v1625_v53  ;;  %v1634_v7 = vmul.f32 %v3727_v3, %v3719_v33 }
 0x71d   : > { %1639 = vrot.lane.b32.xlu0 %v4456_v41, %s4090_s27 }
 0x721   : > { %1789 = vrot.lane.b32.xlu0 %v4401_v23, %s4091_s21 }
 0x725   : > { %1785 = vrot.lane.b32.xlu0 %v4407_v25, %s4091_s21 }
 0x729   : > { %1779 = vrot.lane.b32.xlu0 %v4397_v21, %s4091_s21 }
 0x790   : > { %v1627_v55 = vpop.xlane.xlu0 %1626  ;;  %v3402_v56 = vpop.f32.mrf.mxu1 }
 0x791   : > { %3728 = vrcp.f32 %v1627_v55 }
 0x792   : > { %v1454_v57 = vpop.f32.mrf.mxu1 }
 0x793   : > { %v1463_v59 = vpack.c.bf16 %v3402_v56, %v1454_v57 }
 0x794   : > { %v1640_v63 = vpop.permute.xlu0 %1639 }
 0x795   : > { %3406 = vmatmul.mubr.msk.bf16.vlgmr.msra.gmra.mxu1 %vm735_vm4, %v1463_v59 }
 0x796   : > { %3421 = vmatpush3.msra.mxu1 %v1642_v47 }
 0x797   : > { %3422 = vmatprep.subr.mxu1 %v1640_v63 }
 0x798   : > { %3423 = vmatpush3.msra.mxu1 %v1640_v63  ;;  %v1790_v9 = vpop.permute.xlu0 %1789 }
 0x799   : > { %3424 = vmatprep.subr.mxu1 %v1638_v61 }
 0x79a   : > { %3425 = vmatpush3.msra.mxu1 %v1638_v61  ;;  %v1994_v61 = vld [vmem:[#allocation13 + $0x10] sm:$0xf] }
 0x79b   : > { %3426 = vmatprep.subr.mxu1 %v1636_v2  ;;  %v1999_v4 = vsel %vm604_vm1, %v1994_v61, 0 }
 0x79c   : > { %3427 = vmatpush3.msra.mxu1 %v1636_v2  ;;  %v1786_v19 = vpop.permute.xlu0 %1785 }
 0x79d   : > { %3431 = vmatprep.subr.bf16.mxu1 %v4086_v0 }
 0x79e   : > { %v3729_v5 = vpop.eup %3728 }
 0x79f   : > { %v1633_v6 = vmul.f32 %v3729_v5, %v3725_v52 }
 0x7a0   : > { %v1780_v28 = vpop.permute.xlu0 %1779 }
 0x7a1   : > { %3428 = vmatprep.mubr.msk.f32.mxu1 %vm829_vm5, %v1633_v6 }
 0x7a2   : > { %3429 = vmatmul.mubr.msk.f32.vlgmr.msra.gmra.mxu1 %vm829_vm5, %v1634_v7 }
 0x7a3   : > { %3432 = vmatpush3.bf16.msra.mxu1 %v1734_v8  ;;  %3433 = vmatprep.mubr.msk.bf16.mxu1 %vm4087_vm0, %v4086_v0 }
 0x7a4   : > { %3437 = vmatprep.subr.msk.mxu1 %vm735_vm4, %v1790_v9 }
 0x855   : > { %v1505_v11 = vpop.f32.mrf.mxu1 }
 0x856   : > { %v1512_v12 = vadd.f32 %v1505_v11, %v1243_v10 }
 0x857   : > { %v3407_v13 = vpop.f32.mrf.mxu1 }
 0x859   : > { %v1508_v15 = vpop.f32.mrf.mxu1 }
 0x85a   : > { %v1513_v16 = vadd.f32 %v1508_v15, %v1246_v14 }
 0x85b   : > { %v3408_v17 = vpop.f32.mrf.mxu1 }
 0x862   : > { %v3430_v22 = vpop.f32.mrf.mxu1 }
 0x864   : > { %v1719_v24 = vpop.f32.mrf.mxu1 }
 0x865   : > { %v1728_v27 = vpack.c.bf16 %v3430_v22, %v1719_v24 }
 0x867   : > { %3434 = vmatmul.mubr.msk.bf16.vlgmr.msra.gmra.mxu1 %vm735_vm4, %v1728_v27 }
 0x868   : > { %3438 = vmatpush3.xpose.msk.msra.mxu1 %vm735_vm4, %v1790_v9  ;;  %3445 = vmatprep.mubr.msk.f32.mxu1 %vm735_vm4, %v1780_v28 }
 0x869   : > { %3439 = vmatprep.subr.msk.mxu1 %vm735_vm4, %v1788_v29 }
 0x86c   : > { %3440 = vmatpush3.xpose.msk.msra.mxu1 %vm735_vm4, %v1788_v29 }
 0x86d   : > { %3441 = vmatprep.subr.msk.mxu1 %vm735_vm4, %v1786_v19 }
 0x870   : > { %3442 = vmatpush3.xpose.msk.msra.mxu1 %vm735_vm4, %v1786_v19 }
 0x871   : > { %3443 = vmatprep.subr.msk.mxu1 %vm735_vm4, %v1784_v58 }
 0x874   : > { %3444 = vmatpush3.xpose.msk.msra.mxu1 %vm735_vm4, %v1784_v58 }
 0x877   : > { %3446 = vmatmul.mubr.msk.f32.vlgmr.msra.gmra.mxu1 %vm735_vm4, %v1782_v60 }
 0x927   : > { %v1770_v62 = vpop.f32.mrf.mxu1 }
 0x928   : > { %v4615_v1 = vadd.f32 %v1770_v62, %v1512_v12 }
 0x929   : > { %v3435_v30 = vpop.f32.mrf.mxu1 }
 0x92b   : > { %v1773_v31 = vpop.f32.mrf.mxu1 }
 0x92c   : > { %v4617_v32 = vadd.f32 %v1773_v31, %v1513_v16 }
 0x92d   : > { %v3436_v33 = vpop.f32.mrf.mxu1 }
 0x937   : > { %v3447_v34 = vpop.f32.mrf.mxu1 }
 0x938   : > { %v1881_v35 = vsel %vm829_vm5, %v3447_v34, -inf }
 0x939   : > { %1882 = vmax.xlane.f32.xlu1 %v1881_v35  ;;  %v1869_v36 = vpop.f32.mrf.mxu1 }
 0x93a   : > { %v1878_v37 = vsel %vm829_vm5, %v1869_v36, -inf }
 0x93b   : > { %1879 = vmax.xlane.f32.xlu0 %v1878_v37 }
 0x94a   : > { %1906 = vrot.lane.b32.xlu1 %v4460_v43, %s4091_s21 }
 0x94e   : > { %1902 = vrot.lane.b32.xlu1 %v4470_v48, %s4091_s21 }
 0x952   : > { %1900 = vrot.lane.b32.xlu1 %v4458_v42, %s4091_s21 }
 0x956   : > { %2052 = vrot.lane.b32.xlu1 %v4391_v18, %s4092_s30 }
 0x95a   : > { %2048 = vrot.lane.b32.xlu1 %v4395_v20, %s4092_s30 }
 0x95e   : > { %2046 = vrot.lane.b32.xlu1 %v4411_v26, %s4092_s30 }
 0x9c2   : > { %v1883_v38 = vpop.xlane.xlu1 %1882 }
 0x9c3   : > { %v1885_v39 = vsub.f32 %v3447_v34, %v1883_v38 }
 0x9c4   : > { %v1880_v40 = vpop.xlane.xlu0 %1879 }
 0x9c5   : > { %v1888_v44 = vmul.f32 1.442695, %v1885_v39  ;;  %v1884_v45 = vsub.f32 %v1869_v36, %v1880_v40 }
 0x9c6   : > { %v1907_v46 = vpop.permute.xlu1 %1906 }
 0x9c7   : > { %3730 = vpow2.f32 %v1888_v44  ;;  %v1886_v47 = vmul.f32 1.442695, %v1884_v45  ;;  %3448 = vmatprep.subr.mxu0 %v1907_v46 }
 0x9c8   : > { %3449 = vmatpush3.msra.mxu0 %v1907_v46  ;;  %v2259_v46 = vld [vmem:[#allocation13 + $0x14] sm:$0xf] }
 0x9c9   : > { %3732 = vpow2.f32 %v1886_v47 }
 0x9ca   : > { %v1903_v55 = vpop.permute.xlu1 %1902 }
 0x9ce   : > { %v1901_v57 = vpop.permute.xlu1 %1900 }
 0x9d2   : > { %v2053_v11 = vpop.permute.xlu1 %2052 }
 0x9d4   : > { %v3731_v49 = vpop.eup %3730 }
 0x9d5   : > { %v1893_v50 = vsel %vm829_vm5, %v3731_v49, 0.0 }
 0x9d6   : > { %v3733_v51 = vpop.eup %3732  ;;  %1894 = vadd.xlane.f32.xlu0 %v1893_v50  ;;  %v2049_v12 = vpop.permute.xlu1 %2048 }
 0x9d7   : > { %v1890_v52 = vsel %vm829_vm5, %v3733_v51, 0.0 }
 0x9da   : > { %1891 = vadd.xlane.f32.xlu0 %v1890_v52  ;;  %v2047_v13 = vpop.permute.xlu1 %2046 }
 0x9f0   : > { %1904 = vrot.lane.b32.xlu0 %v4456_v41, %s4091_s21 }
 0x9f4   : > { %2054 = vrot.lane.b32.xlu0 %v4401_v23, %s4092_s30 }
 0x9f8   : > { %2050 = vrot.lane.b32.xlu0 %v4407_v25, %s4092_s30 }
 0x9fc   : > { %2044 = vrot.lane.b32.xlu0 %v4397_v21, %s4092_s30 }
 0xa5f   : > { %v1895_v53 = vpop.xlane.xlu0 %1894 }
 0xa60   : > { %3734 = vrcp.f32 %v1895_v53 }
 0xa63   : > { %v1892_v54 = vpop.xlane.xlu0 %1891 }
 0xa64   : > { %3736 = vrcp.f32 %v1892_v54 }
 0xa67   : > { %v1905_v56 = vpop.permute.xlu0 %1904 }
 0xa68   : > { %3450 = vmatprep.subr.mxu0 %v1905_v56 }
 0xa69   : > { %3451 = vmatpush3.msra.mxu0 %v1905_v56 }
 0xa6a   : > { %3452 = vmatprep.subr.mxu0 %v1903_v55 }
 0xa6b   : > { %3453 = vmatpush3.msra.mxu0 %v1903_v55  ;;  %v2055_v5 = vpop.permute.xlu0 %2054 }
 0xa6c   : > { %3454 = vmatprep.subr.mxu0 %v1901_v57 }
 0xa6d   : > { %3455 = vmatpush3.msra.mxu0 %v1901_v57  ;;  %v3735_v59 = vpop.eup %3734 }
 0xa6e   : > { %3459 = vmatprep.subr.bf16.mxu0 %v4086_v0  ;;  %v1899_v3 = vmul.f32 %v3735_v59, %v3731_v49 }
 0xa6f   : > { %v2051_v6 = vpop.permute.xlu0 %2050 }
 0xa71   : > { %v3737_v63 = vpop.eup %3736 }
 0xa72   : > { %v1898_v2 = vmul.f32 %v3737_v63, %v3733_v51  ;;  %v2264_v51 = vsel %vm604_vm1, %v2259_v46, 0 }
 0xa73   : > { %v2045_v10 = vpop.permute.xlu0 %2044 }
 0xa74   : > { %3456 = vmatprep.mubr.msk.f32.mxu0 %vm829_vm5, %v1898_v2 }
 0xa75   : > { %3457 = vmatmul.mubr.msk.f32.vlgmr.msra.gmra.mxu0 %vm829_vm5, %v1899_v3 }
 0xa76   : > { %3460 = vmatpush3.bf16.msra.mxu0 %v1999_v4  ;;  %3461 = vmatprep.mubr.msk.bf16.mxu0 %vm4087_vm0, %v4086_v0 }
 0xa77   : > { %3465 = vmatprep.subr.msk.mxu0 %vm735_vm4, %v2055_v5 }
 0xb35   : > { %v3458_v7 = vpop.f32.mrf.mxu0 }
 0xb37   : > { %v1984_v8 = vpop.f32.mrf.mxu0 }
 0xb38   : > { %v1993_v9 = vpack.c.bf16 %v3458_v7, %v1984_v8 }
 0xb3a   : > { %3462 = vmatmul.mubr.msk.bf16.vlgmr.msra.gmra.mxu0 %vm735_vm4, %v1993_v9 }
 0xb3b   : > { %3466 = vmatpush3.xpose.msk.msra.mxu0 %vm735_vm4, %v2055_v5  ;;  %3473 = vmatprep.mubr.msk.f32.mxu0 %vm735_vm4, %v2045_v10 }
 0xb3c   : > { %3467 = vmatprep.subr.msk.mxu0 %vm735_vm4, %v2053_v11 }
 0xb3f   : > { %3468 = vmatpush3.xpose.msk.msra.mxu0 %vm735_vm4, %v2053_v11 }
 0xb40   : > { %3469 = vmatprep.subr.msk.mxu0 %vm735_vm4, %v2051_v6 }
 0xb43   : > { %3470 = vmatpush3.xpose.msk.msra.mxu0 %vm735_vm4, %v2051_v6 }
 0xb44   : > { %3471 = vmatprep.subr.msk.mxu0 %vm735_vm4, %v2049_v12 }
 0xb47   : > { %3472 = vmatpush3.xpose.msk.msra.mxu0 %vm735_vm4, %v2049_v12 }
 0xb4a   : > { %3474 = vmatmul.mubr.msk.f32.vlgmr.msra.gmra.mxu0 %vm735_vm4, %v2047_v13 }
 0xbfa   : > { %v2035_v14 = vpop.f32.mrf.mxu0 }
 0xbfb   : > { %v4661_v15 = vadd.f32 %v2035_v14, %v4615_v1 }
 0xbfc   : > { %v3463_v16 = vpop.f32.mrf.mxu0 }
 0xbfe   : > { %v2038_v17 = vpop.f32.mrf.mxu0 }
 0xbff   : > { %v4664_v19 = vadd.f32 %v2038_v17, %v4617_v32 }
 0xc00   : > { %v3464_v22 = vpop.f32.mrf.mxu0 }
 0xc0a   : > { %v3475_v24 = vpop.f32.mrf.mxu0 }
 0xc0b   : > { %v2146_v27 = vsel %vm829_vm5, %v3475_v24, -inf }
 0xc0c   : > { %2147 = vmax.xlane.f32.xlu1 %v2146_v27  ;;  %v2134_v28 = vpop.f32.mrf.mxu0 }
 0xc0d   : > { %v2143_v29 = vsel %vm829_vm5, %v2134_v28, -inf }
 0xc0e   : > { %2144 = vmax.xlane.f32.xlu0 %v2143_v29 }
 0xc1d   : > { %2171 = vrot.lane.b32.xlu1 %v4460_v43, %s4092_s30 }
 0xc21   : > { %2167 = vrot.lane.b32.xlu1 %v4470_v48, %s4092_s30 }
 0xc25   : > { %2165 = vrot.lane.b32.xlu1 %v4458_v42, %s4092_s30 }
 0xc29   : > { %2317 = vrot.lane.b32.xlu1 %v4391_v18, %s4093_s14 }
 0xc2d   : > { %2313 = vrot.lane.b32.xlu1 %v4395_v20, %s4093_s14 }
 0xc31   : > { %2311 = vrot.lane.b32.xlu1 %v4411_v26, %s4093_s14 }
 0xc95   : > { %v2148_v58 = vpop.xlane.xlu1 %2147 }
 0xc96   : > { %v2150_v60 = vsub.f32 %v3475_v24, %v2148_v58 }
 0xc97   : > { %v2145_v62 = vpop.xlane.xlu0 %2144 }
 0xc98   : > { %v2153_v1 = vmul.f32 1.442695, %v2150_v60  ;;  %v2149_v30 = vsub.f32 %v2134_v28, %v2145_v62 }
 0xc99   : > { %v2172_v31 = vpop.permute.xlu1 %2171 }
 0xc9a   : > { %3738 = vpow2.f32 %v2153_v1  ;;  %v2151_v32 = vmul.f32 1.442695, %v2149_v30  ;;  %3476 = vmatprep.subr.mxu1 %v2172_v31 }
 0xc9b   : > { %3477 = vmatpush3.msra.mxu1 %v2172_v31 }
 0xc9c   : > { %3740 = vpow2.f32 %v2151_v32 }
 0xc9d   : > { %v2168_v39 = vpop.permute.xlu1 %2167 }
 0xca1   : > { %v2166_v44 = vpop.permute.xlu1 %2165 }
 0xca5   : > { %v2318_v59 = vpop.permute.xlu1 %2317 }
 0xca7   : > { %v3739_v33 = vpop.eup %3738 }
 0xca8   : > { %v2158_v34 = vsel %vm829_vm5, %v3739_v33, 0.0 }
 0xca9   : > { %v3741_v35 = vpop.eup %3740  ;;  %2159 = vadd.xlane.f32.xlu0 %v2158_v34  ;;  %v2314_v61 = vpop.permute.xlu1 %2313 }
 0xcaa   : > { %v2155_v36 = vsel %vm829_vm5, %v3741_v35, 0.0 }
 0xcad   : > { %2156 = vadd.xlane.f32.xlu0 %v2155_v36  ;;  %v2312_v63 = vpop.permute.xlu1 %2311 }
 0xcc3   : > { %2169 = vrot.lane.b32.xlu0 %v4456_v41, %s4092_s30 }
 0xcc7   : > { %2319 = vrot.lane.b32.xlu0 %v4401_v23, %s4093_s14 }
 0xccb   : > { %2315 = vrot.lane.b32.xlu0 %v4407_v25, %s4093_s14 }
 0xccf   : > { %2309 = vrot.lane.b32.xlu0 %v4397_v21, %s4093_s14 }
 0xd32   : > { %v2160_v37 = vpop.xlane.xlu0 %2159 }
 0xd33   : > { %3742 = vrcp.f32 %v2160_v37 }
 0xd36   : > { %v2157_v38 = vpop.xlane.xlu0 %2156 }
 0xd37   : > { %3744 = vrcp.f32 %v2157_v38 }
 0xd3a   : > { %v2170_v40 = vpop.permute.xlu0 %2169 }
 0xd3b   : > { %3478 = vmatprep.subr.mxu1 %v2170_v40 }
 0xd3c   : > { %3479 = vmatpush3.msra.mxu1 %v2170_v40 }
 0xd3d   : > { %3480 = vmatprep.subr.mxu1 %v2168_v39 }
 0xd3e   : > { %3481 = vmatpush3.msra.mxu1 %v2168_v39  ;;  %v2320_v52 = vpop.permute.xlu0 %2319 }
 0xd3f   : > { %3482 = vmatprep.subr.mxu1 %v2166_v44 }
 0xd40   : > { %3483 = vmatpush3.msra.mxu1 %v2166_v44  ;;  %v3743_v45 = vpop.eup %3742 }
 0xd41   : > { %3487 = vmatprep.subr.bf16.mxu1 %v4086_v0  ;;  %v2164_v50 = vmul.f32 %v3743_v45, %v3739_v33 }
 0xd42   : > { %v2316_v53 = vpop.permute.xlu0 %2315 }
 0xd44   : > { %v3745_v47 = vpop.eup %3744 }
 0xd45   : > { %v2163_v49 = vmul.f32 %v3745_v47, %v3741_v35 }
 0xd46   : > { %v2310_v57 = vpop.permute.xlu0 %2309 }
 0xd47   : > { %3484 = vmatprep.mubr.msk.f32.mxu1 %vm829_vm5, %v2163_v49 }
 0xd48   : > { %3485 = vmatmul.mubr.msk.f32.vlgmr.msra.gmra.mxu1 %vm829_vm5, %v2164_v50 }
 0xd49   : > { %3488 = vmatpush3.bf16.msra.mxu1 %v2264_v51  ;;  %3489 = vmatprep.mubr.msk.bf16.mxu1 %vm4087_vm0, %v4086_v0 }
 0xd4a   : > { %3493 = vmatprep.subr.msk.mxu1 %vm735_vm4, %v2320_v52 }
 0xe08   : > { %v3486_v54 = vpop.f32.mrf.mxu1 }
 0xe0a   : > { %v2249_v55 = vpop.f32.mrf.mxu1 }
 0xe0b   : > { %v2258_v56 = vpack.c.bf16 %v3486_v54, %v2249_v55 }
 0xe0d   : > { %3490 = vmatmul.mubr.msk.bf16.vlgmr.msra.gmra.mxu1 %vm735_vm4, %v2258_v56 }
 0xe0e   : > { %3494 = vmatpush3.xpose.msk.msra.mxu1 %vm735_vm4, %v2320_v52  ;;  %3501 = vmatprep.mubr.msk.f32.mxu1 %vm735_vm4, %v2310_v57 }
 0xe0f   : > { %3495 = vmatprep.subr.msk.mxu1 %vm735_vm4, %v2318_v59 }
 0xe12   : > { %3496 = vmatpush3.xpose.msk.msra.mxu1 %vm735_vm4, %v2318_v59 }
 0xe13   : > { %3497 = vmatprep.subr.msk.mxu1 %vm735_vm4, %v2316_v53 }
 0xe16   : > { %3498 = vmatpush3.xpose.msk.msra.mxu1 %vm735_vm4, %v2316_v53 }
 0xe17   : > { %3499 = vmatprep.subr.msk.mxu1 %vm735_vm4, %v2314_v61 }
 0xe1a   : > { %3500 = vmatpush3.xpose.msk.msra.mxu1 %vm735_vm4, %v2314_v61 }
 0xe1d   : > { %3502 = vmatmul.mubr.msk.f32.vlgmr.msra.gmra.mxu1 %vm735_vm4, %v2312_v63 }
 0xecd   : > { %v2300_v2 = vpop.f32.mrf.mxu1 }
 0xece   : > { %v4708_v3 = vadd.f32 %v2300_v2, %v4661_v15 }
 0xecf   : > { %v3491_v4 = vpop.f32.mrf.mxu1 }
 0xed1   : > { %v2303_v5 = vpop.f32.mrf.mxu1 }
 0xed2   : > { %v4711_v6 = vadd.f32 %v2303_v5, %v4664_v19 }
 0xed3   : > { %v3492_v7 = vpop.f32.mrf.mxu1 }
 0xedd   : > { %v3503_v8 = vpop.f32.mrf.mxu1 }
 0xede   : > { %v2411_v9 = vsel %vm829_vm5, %v3503_v8, -inf }
 0xedf   : > { %2412 = vmax.xlane.f32.xlu1 %v2411_v9  ;;  %v2399_v10 = vpop.f32.mrf.mxu1 }
 0xee0   : > { %v2408_v11 = vsel %vm829_vm5, %v2399_v10, -inf }
 0xee1   : > { %2409 = vmax.xlane.f32.xlu0 %v2408_v11 }
 0xef0   : > { %2436 = vrot.lane.b32.xlu1 %v4460_v43, %s4093_s14 }
 0xef4   : > { %2432 = vrot.lane.b32.xlu1 %v4470_v48, %s4093_s14 }
 0xef8   : > { %2430 = vrot.lane.b32.xlu1 %v4458_v42, %s4093_s14 }
 0xefc   : > { %2582 = vrot.lane.b32.xlu1 %v4391_v18, %s4094_s1 }
 0xf00   : > { %2578 = vrot.lane.b32.xlu1 %v4395_v20, %s4094_s1 }
 0xf04   : > { %2576 = vrot.lane.b32.xlu1 %v4411_v26, %s4094_s1 }
 0xf68   : > { %v2413_v12 = vpop.xlane.xlu1 %2412 }
 0xf69   : > { %v2415_v13 = vsub.f32 %v3503_v8, %v2413_v12 }
 0xf6a   : > { %v2410_v14 = vpop.xlane.xlu0 %2409 }
 0xf6b   : > { %v2418_v15 = vmul.f32 1.442695, %v2415_v13  ;;  %v2414_v16 = vsub.f32 %v2399_v10, %v2410_v14 }
 0xf6c   : > { %v2437_v17 = vpop.permute.xlu1 %2436 }
 0xf6d   : > { %3746 = vpow2.f32 %v2418_v15  ;;  %v2416_v19 = vmul.f32 1.442695, %v2414_v16  ;;  %3504 = vmatprep.subr.mxu0 %v2437_v17  ;;  %v3159_v16 = vld [vmem:[#allocation14] ss:$0 sm:$0xff] }
 0xf6e   : > { %3505 = vmatpush3.msra.mxu0 %v2437_v17 }
 0xf6f   : > { %3748 = vpow2.f32 %v2416_v19 }
 0xf70   : > { %v2433_v28 = vpop.permute.xlu1 %2432 }
 0xf74   : > { %v2431_v58 = vpop.permute.xlu1 %2430 }
 0xf78   : > { %v2583_v36 = vpop.permute.xlu1 %2582 }
 0xf7a   : > { %v3747_v22 = vpop.eup %3746 }
 0xf7b   : > { %v2423_v18 = vsel %vm829_vm5, %v3747_v22, 0.0 }
 0xf7c   : > { %v3749_v24 = vpop.eup %3748  ;;  %2424 = vadd.xlane.f32.xlu0 %v2423_v18  ;;  %v2579_v37 = vpop.permute.xlu1 %2578 }
 0xf7d   : > { %v2420_v20 = vsel %vm829_vm5, %v3749_v24, 0.0 }
 0xf80   : > { %2421 = vadd.xlane.f32.xlu0 %v2420_v20  ;;  %v2577_v38 = vpop.permute.xlu1 %2576 }
 0xf96   : > { %2434 = vrot.lane.b32.xlu0 %v4456_v41, %s4093_s14 }
 0xf9a   : > { %2584 = vrot.lane.b32.xlu0 %v4401_v23, %s4094_s1 }
 0xf9e   : > { %2580 = vrot.lane.b32.xlu0 %v4407_v25, %s4094_s1  ;;  %v2524_v25 = vld [vmem:[#allocation13 + $0x18] sm:$0xf] }
 0xf9f   : > { %v2529_v1 = vsel %vm604_vm1, %v2524_v25, 0 }
 0xfa2   : > { %2574 = vrot.lane.b32.xlu0 %v4397_v21, %s4094_s1 }
0x1005   : > { %v2425_v26 = vpop.xlane.xlu0 %2424 }
0x1006   : > { %3750 = vrcp.f32 %v2425_v26 }
0x1009   : > { %v2422_v27 = vpop.xlane.xlu0 %2421 }
0x100a   : > { %3752 = vrcp.f32 %v2422_v27 }
0x100d   : > { %v2435_v29 = vpop.permute.xlu0 %2434 }
0x100e   : > { %3506 = vmatprep.subr.mxu0 %v2435_v29 }
0x100f   : > { %3507 = vmatpush3.msra.mxu0 %v2435_v29 }
0x1010   : > { %3508 = vmatprep.subr.mxu0 %v2433_v28 }
0x1011   : > { %3509 = vmatpush3.msra.mxu0 %v2433_v28  ;;  %v2585_v30 = vpop.permute.xlu0 %2584 }
0x1012   : > { %3510 = vmatprep.subr.mxu0 %v2431_v58 }
0x1013   : > { %3511 = vmatpush3.msra.mxu0 %v2431_v58  ;;  %v3751_v23 = vpop.eup %3750 }
0x1014   : > { %3515 = vmatprep.subr.bf16.mxu0 %v4086_v0  ;;  %v2429_v21 = vmul.f32 %v3751_v23, %v3747_v22 }
0x1015   : > { %v2581_v31 = vpop.permute.xlu0 %2580 }
0x1017   : > { %v3753_v60 = vpop.eup %3752 }
0x1018   : > { %v2428_v62 = vmul.f32 %v3753_v60, %v3749_v24 }
0x1019   : > { %v2575_v35 = vpop.permute.xlu0 %2574 }
0x101a   : > { %3512 = vmatprep.mubr.msk.f32.mxu0 %vm829_vm5, %v2428_v62 }
0x101b   : > { %3513 = vmatmul.mubr.msk.f32.vlgmr.msra.gmra.mxu0 %vm829_vm5, %v2429_v21 }
0x101c   : > { %3516 = vmatpush3.bf16.msra.mxu0 %v2529_v1  ;;  %3517 = vmatprep.mubr.msk.bf16.mxu0 %vm4087_vm0, %v4086_v0 }
0x101d   : > { %3521 = vmatprep.subr.msk.mxu0 %vm735_vm4, %v2585_v30 }
0x10db   : > { %v3514_v32 = vpop.f32.mrf.mxu0 }
0x10dd   : > { %v2514_v33 = vpop.f32.mrf.mxu0 }
0x10de   : > { %v2523_v34 = vpack.c.bf16 %v3514_v32, %v2514_v33 }
0x10e0   : > { %3518 = vmatmul.mubr.msk.bf16.vlgmr.msra.gmra.mxu0 %vm735_vm4, %v2523_v34 }
0x10e1   : > { %3522 = vmatpush3.xpose.msk.msra.mxu0 %vm735_vm4, %v2585_v30  ;;  %3529 = vmatprep.mubr.msk.f32.mxu0 %vm735_vm4, %v2575_v35 }
0x10e2   : > { %3523 = vmatprep.subr.msk.mxu0 %vm735_vm4, %v2583_v36 }
0x10e5   : > { %3524 = vmatpush3.xpose.msk.msra.mxu0 %vm735_vm4, %v2583_v36 }
0x10e6   : > { %3525 = vmatprep.subr.msk.mxu0 %vm735_vm4, %v2581_v31 }
0x10e9   : > { %3526 = vmatpush3.xpose.msk.msra.mxu0 %vm735_vm4, %v2581_v31 }
0x10ea   : > { %3527 = vmatprep.subr.msk.mxu0 %vm735_vm4, %v2579_v37 }
0x10ed   : > { %3528 = vmatpush3.xpose.msk.msra.mxu0 %vm735_vm4, %v2579_v37 }
0x10f0   : > { %3530 = vmatmul.mubr.msk.f32.vlgmr.msra.gmra.mxu0 %vm735_vm4, %v2577_v38 }
0x11a0   : > { %v2565_v39 = vpop.f32.mrf.mxu0 }
0x11a1   : > { %v2572_v40 = vadd.f32 %v2565_v39, %v4708_v3 }
0x11a2   : > { %v3519_v44 = vpop.f32.mrf.mxu0 }
0x11a4   : > { %v2568_v45 = vpop.f32.mrf.mxu0 }
0x11a5   : > { %v4756_v46 = vadd.f32 %v2568_v45, %v4711_v6 }
0x11a6   : > { %v3520_v47 = vpop.f32.mrf.mxu0 }
0x11b0   : > { %v3531_v49 = vpop.f32.mrf.mxu0 }
0x11b1   : > { %v2676_v50 = vsel %vm829_vm5, %v3531_v49, -inf }
0x11b2   : > { %2677 = vmax.xlane.f32.xlu1 %v2676_v50  ;;  %v2664_v51 = vpop.f32.mrf.mxu0 }
0x11b3   : > { %v2673_v52 = vsel %vm829_vm5, %v2664_v51, -inf }
0x11b4   : > { %2674 = vmax.xlane.f32.xlu0 %v2673_v52 }
0x11c3   : > { %2701 = vrot.lane.b32.xlu1 %v4460_v43, %s4094_s1 }
0x11c7   : > { %2697 = vrot.lane.b32.xlu1 %v4470_v48, %s4094_s1 }
0x11cb   : > { %2695 = vrot.lane.b32.xlu1 %v4458_v42, %s4094_s1 }
0x123b   : > { %v2678_v53 = vpop.xlane.xlu1 %2677 }
0x123c   : > { %v2680_v54 = vsub.f32 %v3531_v49, %v2678_v53 }
0x123d   : > { %v2675_v55 = vpop.xlane.xlu0 %2674 }
0x123e   : > { %v2683_v56 = vmul.f32 1.442695, %v2680_v54  ;;  %v2679_v57 = vsub.f32 %v2664_v51, %v2675_v55 }
0x123f   : > { %v2702_v59 = vpop.permute.xlu1 %2701 }
0x1240   : > { %3754 = vpow2.f32 %v2683_v56  ;;  %v2681_v61 = vmul.f32 1.442695, %v2679_v57  ;;  %3532 = vmatprep.subr.mxu1 %v2702_v59 }
0x1241   : > { %3533 = vmatpush3.msra.mxu1 %v2702_v59 }
0x1242   : > { %3756 = vpow2.f32 %v2681_v61 }
0x1243   : > { %v2698_v4 = vpop.permute.xlu1 %2697 }
0x1247   : > { %v2696_v6 = vpop.permute.xlu1 %2695 }
0x124d   : > { %v3755_v63 = vpop.eup %3754 }
0x124e   : > { %v2688_v43 = vsel %vm829_vm5, %v3755_v63, 0.0 }
0x124f   : > { %v3757_v2 = vpop.eup %3756  ;;  %2689 = vadd.xlane.f32.xlu0 %v2688_v43 }
0x1250   : > { %v2685_v48 = vsel %vm829_vm5, %v3757_v2, 0.0 }
0x1253   : > { %2686 = vadd.xlane.f32.xlu0 %v2685_v48 }
0x1269   : > { %2699 = vrot.lane.b32.xlu0 %v4456_v41, %s4094_s1  ;;  %v2789_v41 = vld [vmem:[#allocation13 + $0x1c] sm:$0xf] }
0x126a   : > { %v2794_v11 = vsel %vm604_vm1, %v2789_v41, 0 }
0x12d8   : > { %v2690_v42 = vpop.xlane.xlu0 %2689 }
0x12d9   : > { %3758 = vrcp.f32 %v2690_v42 }
0x12dc   : > { %v2687_v3 = vpop.xlane.xlu0 %2686 }
0x12dd   : > { %3760 = vrcp.f32 %v2687_v3 }
0x12e0   : > { %v2700_v5 = vpop.permute.xlu0 %2699 }
0x12e1   : > { %3534 = vmatprep.subr.mxu1 %v2700_v5 }
0x12e2   : > { %3535 = vmatpush3.msra.mxu1 %v2700_v5 }
0x12e3   : > { %3536 = vmatprep.subr.mxu1 %v2698_v4 }
0x12e4   : > { %3537 = vmatpush3.msra.mxu1 %v2698_v4 }
0x12e5   : > { %3538 = vmatprep.subr.mxu1 %v2696_v6 }
0x12e6   : > { %3539 = vmatpush3.msra.mxu1 %v2696_v6  ;;  %v3759_v7 = vpop.eup %3758 }
0x12e7   : > { %3543 = vmatprep.subr.bf16.mxu1 %v4086_v0  ;;  %v2694_v10 = vmul.f32 %v3759_v7, %v3755_v63 }
0x12ea   : > { %v3761_v8 = vpop.eup %3760 }
0x12eb   : > { %v2693_v9 = vmul.f32 %v3761_v8, %v3757_v2 }
0x12ed   : > { %3540 = vmatprep.mubr.msk.f32.mxu1 %vm829_vm5, %v2693_v9 }
0x12ee   : > { %3541 = vmatmul.mubr.msk.f32.vlgmr.msra.gmra.mxu1 %vm829_vm5, %v2694_v10 }
0x12ef   : > { %3545 = vmatprep.mubr.msk.bf16.mxu1 %vm4087_vm0, %v4086_v0  ;;  %3544 = vmatpush3.bf16.msra.mxu1 %v2794_v11 }
0x13ae   : > { %v3542_v12 = vpop.f32.mrf.mxu1 }
0x13b0   : > { %v2779_v13 = vpop.f32.mrf.mxu1 }
0x13b1   : > { %v2788_v14 = vpack.c.bf16 %v3542_v12, %v2779_v13 }
0x13b3   : > { %3546 = vmatmul.mubr.msk.bf16.vlgmr.msra.gmra.mxu1 %vm735_vm4, %v2788_v14 }
0x1473   : > { %v2830_v15 = vpop.f32.mrf.mxu1 }
0x1474   : > { %v2837_v17 = vadd.f32 %v2830_v15, %v2572_v40 }
0x1475   : > { %v3547_v19 = vpop.f32.mrf.mxu1 }
0x1476   : > { %v2846_v22 = vadd.f32 %v3159_v16, %v2837_v17 }
0x1477   : > { %v2833_v0 = vpop.f32.mrf.mxu1 }
0x1478   : > { %2849 = vst.msk [vmem:[%s489_s16] sm:$0xff] %vm2848_vm6, %v2846_v22  ;;  %v2838_v18 = vadd.f32 %v2833_v0, %v4756_v46 }
0x1479   : > { %v3548_v24 = vpop.f32.mrf.mxu1 }
0x147a   : > { %v2847_v20 = vadd.f32 %v3159_v16, %v2838_v18 }
0x147c   : > { %2850 = vst.msk [vmem:[%s489_s16 + $0x8] sm:$0xff] %vm2848_vm6, %v2847_v20 }
0x147d   : > { %3989 = shalt.err (!%p3986_p3)
}
0x147e   : > { %s3990_s20 = scalar_lea.hbm %s4784_s18, 256  ;;  %s3994_s19 = scalar_lea.hbm %s4894_s8, 512 }
0x147f   : > { %p3991_p9 = scmp.ne.s32.totalorder %s4784_s18, %s3990_s20  ;;  %p3995_p1 = scmp.lt.s32.totalorder %s4784_s18, %s4894_s8 }
0x1480   : > { %p3996_p4 = scmp.lt.s32.totalorder %s3994_s19, %s3990_s20 }
0x1481   : > { %p3992_p12 = pnand %p3991_p9, %p4239_p13 }
0x1482   : > { %p3997_p5 = por %p3996_p4, %p3995_p1 }
0x1483   : > { %p3993_p0 = pneg %p3992_p12 }
0x1485   : > { %p3998_p11 = pnand %p3997_p5, %p3993_p0 }
0x1487   : > { %4001 = shalt.err (!%p3998_p11)
}
0x1488   : > { %s4096_s30 = smov 128   ;;  %s4097_s14 = smov 8  }
0x1489   : > { %3577 = dma.vmem_to_hbm [thread:$0]  (%p4239_p13), %s4786_s23, 256, %s4784_s18, %s2852_s26, %s4096_s30, %s4096_s30, %s4097_s14  }
0x148a PF: > { %s4895_s1 = sld [smem:[#allocation23_spill]] }
0x148b   : > { %s4896_s29 = sld [smem:[#allocation30_spill]] }
0x148c   : > { %s4897_s17 = sld [smem:[#allocation26_spill]] }
0x1490   : > { %s2882_s16 = sand.u32 1, %s4895_s1  }
0x1491   : > { %p4898_p8 = scmp.ne.s32.totalorder %s4896_s29, 0  ;;  %s2883_s13 = scalar_lea.sflag [#allocation4], %s2882_s16 }
0x1492   : > { %p4899_p6 = scmp.ge.s32.totalorder %s4897_s17, 2 }
0x1494   : > { %p3606_p10 = pnand %p4899_p6, %p4898_p8 }
0x1496   : > { %p3607_p2 = pneg %p3606_p10 }
0x1498   : > { %4047 = dma.done.wait (%p3607_p2), %s2883_s13, 256  }
0x1499   : > { %4049 = vsyncadd (%p3607_p2), %s2883_s13, 4294967040  ;;  %s30_s10 = sadd.s32 1, %s4897_s17   ;;  %s4900_s25 = sld [smem:[#allocation24_spill]] }
0x149a   : > { %p27_p7 = scmp.ge.s32.totalorder %s30_s10, 4   ;;  %s4901_s29 = sld [smem:[#allocation29_spill]] }
0x149b   : > { %s4902_s22 = sld [smem:[#allocation27_spill]]  ;;  %s4903_s27 = smov %s4056_s28 }
0x149c   : > { %s4905_s30 = smov %s4068_s9 }
0x149d   :  { %29 = sbr.rel (!%p27_p7) target bundleno = 16 (0x10), region = 141 }
0x149f   : > { %s4904_s28 = smov %s4900_s25 }
0x14a1   : > { %s4906_s9 = smov %s4902_s22 }
0x14a2   :  { %2888 = vsyncpa [#allocation3], 1 }
0x14a3   :  { %2890 = vsyncpa [#allocation3 + $0x1], 1 }
0x14a4   :  { %2891 = vsyncpa [#allocation6], 1 }
0x14a5   :  { %2893 = vsyncpa [#allocation6 + $0x1], 1 }
0x14a6   :  { %2894 = vsyncpa [#allocation9], 1 }
0x14a7   :  { %2895 = vsyncpa [#allocation12], 1 }
0x14a8   :  { %2896 = vsyncpa [#allocation15], 1 }
0x14a9   :  { %2897 = vsyncpa [#allocation4], 1 }
0x14aa   :  { %2899 = vsyncpa [#allocation4 + $0x1], 1 }

</bundles_post_ra>
